<compile_context>
chip_gen: v5e
topology: v5e:2x2
jax: 0.10.0
libtpu: 0.0.40
codegen_flags: <defaults>
</compile_context>

<pallas_src>
import math

import jax
import jax.numpy as jnp
from jax.experimental import pallas as pl
from jax.experimental.pallas import tpu as pltpu


def _build_kernel(*, c_in, c_out, d_out, stride, t_out_pad, bt):
    """Returns the fused LGBlock kernel specialized to static shape params."""
    n = bt * t_out_pad
    bf16 = jnp.bfloat16
    f32 = jnp.float32

    def kernel(x_ref, w1_ref, wsc_ref, sh_ref, w2_ref, em_ref, pe_ref,
               bias_ref, wqkv_ref, bqkv_ref, wo_ref, bo_ref, o_ref):
        # ---- conv1 taps from the stride-grouped input (1x HBM, no 3x slab) ----
        xg = x_ref[...]                                   # (bt, G, stride*c_in) bf16

        def tap(j):
            g0 = j // stride
            l0 = (j % stride) * c_in
            return xg[:, g0:g0 + t_out_pad, l0:l0 + c_in].reshape(n, c_in)

        t0, t1, t2 = tap(0), tap(1), tap(2)

        # ---- conv1 (3x1, stride s) + folded BN + ReLU; 1x1 shortcut + BN ----
        h1 = (jnp.dot(t0, w1_ref[0], preferred_element_type=f32)
              + jnp.dot(t1, w1_ref[1], preferred_element_type=f32)
              + jnp.dot(t2, w1_ref[2], preferred_element_type=f32)
              + sh_ref[0:1, :])
        h1 = jnp.maximum(h1, 0.0)
        res = jnp.dot(t1, wsc_ref[...], preferred_element_type=f32) + sh_ref[2:3, :]

        # ---- conv2 (3x1, stride 1): taps via flattened sublane rolls; the
        #      precomputed edge mask zeroes time-boundary / cross-batch rows ----
        h1_m1 = pltpu.roll(h1, 1, axis=0) * em_ref[:, 0:1]
        h1_p1 = pltpu.roll(h1, n - 1, axis=0) * em_ref[:, 1:2]
        h2 = (jnp.dot(h1_m1.astype(bf16), w2_ref[0], preferred_element_type=f32)
              + jnp.dot(h1.astype(bf16), w2_ref[1], preferred_element_type=f32)
              + jnp.dot(h1_p1.astype(bf16), w2_ref[2], preferred_element_type=f32)
              + sh_ref[1:2, :])

        # ---- residual add, ReLU, positional encoding (dropout = identity) ----
        y = jnp.maximum(h2 + res, 0.0) + pe_ref[...]      # (n, c_out) f32

        # ---- fused QKV projection + flattened block-diagonal attention ----
        qkv = (jnp.dot(y.astype(bf16), wqkv_ref[...], preferred_element_type=f32)
               + bqkv_ref[...])
        q = qkv[:, :c_out].astype(bf16)                   # 1/sqrt(d) folded into Wq
        k = qkv[:, c_out:2 * c_out].astype(bf16)
        v = qkv[:, 2 * c_out:].astype(bf16)

        scores = jax.lax.dot_general(                     # one dense (N, N) MXU push
            q, k, (((1,), (1,)), ((), ())), preferred_element_type=f32)
        scores = scores + bias_ref[...]                   # block-diag + key mask
        m = jnp.max(scores, axis=-1, keepdims=True)
        e = jnp.exp(scores - m)
        attn = e * pl.reciprocal(jnp.sum(e, axis=-1, keepdims=True), approx=False)
        ctx = jnp.dot(attn.astype(bf16), v, preferred_element_type=f32)

        out = (jnp.dot(ctx.astype(bf16), wo_ref[...], preferred_element_type=f32)
               + bo_ref[...])                             # (n, d_out) f32
        o_ref[...] = out.reshape(bt, t_out_pad, d_out).astype(o_ref.dtype)

    return kernel


def lgblock_forward(x_nchw, params, *, stride):
    B, c_in, T, W = x_nchw.shape
    assert W == 1, "LGBlock expects width-1 input (kernel size (3,1))"
    c_out = params["w1"].shape[-1]
    d_out = params["wo"].shape[-1]
    bf16 = jnp.bfloat16

    t_out = (T + 2 - 3) // stride + 1                     # real output length
    assert params["pe_table"].shape[0] >= t_out, "max_len must cover t_out"
    t_out_pad = -(-t_out // 8) * 8                        # sublane-aligned time

    # ---- batch tile: ~256 flattened MXU rows per step; pad B, don't shrink bt.
    #      For tiny batches, cap padding waste while keeping >=128 rows/push. ----
    bt = max(1, 256 // t_out_pad)
    while bt > 1 and bt * t_out_pad >= 2 * 128 and B <= bt // 2:
        bt //= 2
    b_pad = -(-B // bt) * bt
    n_rows = bt * t_out_pad

    # ---- stride-grouped input slab: conv tap k lives at
    #      (group t + k//s, lanes (k%s)*c_in : (k%s+1)*c_in)  -> 1x-sized HBM ----
    G = t_out_pad + 2 // stride
    L = stride * G
    x = jnp.transpose(x_nchw[..., 0], (0, 2, 1))          # (B, T, C_in)
    tail = 1 + max(0, L - (T + 2))                        # conv right-pad + align
    xb = jnp.pad(x, ((0, b_pad - B), (1, tail), (0, 0)))[:, :L]
    x_g = xb.reshape(b_pad, G, stride * c_in).astype(bf16)

    # ---- fold / pack parameters (tiny one-off XLA prep); bf16 MXU operands ----
    w1 = params["w1"].astype(bf16)                        # (3, c_in, c_out)
    wsc = params["wsc"].astype(bf16)                      # (c_in, c_out)
    w2 = params["w2"].astype(bf16)                        # (3, c_out, c_out)
    shifts = jnp.concatenate(
        [params["s1"], params["s2"], params["ssc"]], axis=0)      # (3, c_out) f32

    inv_sqrt = 1.0 / math.sqrt(c_out)                     # fold 1/sqrt(d) into Wq
    wqkv = jnp.concatenate(
        [params["wq"] * inv_sqrt, params["wk"], params["wv"]], axis=1).astype(bf16)
    bqkv = jnp.concatenate(
        [params["bq"] * inv_sqrt, params["bk"], params["bv"]], axis=1)
    wo = params["wo"].astype(bf16)                        # (c_out, d_out)
    bo = params["bo"]                                     # (1, d_out) f32

    pe = params["pe_table"][:t_out].astype(jnp.float32)
    if t_out_pad > t_out:
        pe = jnp.pad(pe, ((0, t_out_pad - t_out), (0, 0)))
    pe_full = jnp.tile(pe, (bt, 1))                       # (n_rows, c_out)

    # conv2 boundary mask (col 0: "prev tap valid", col 1: "next tap valid")
    t_idx = jnp.arange(n_rows, dtype=jnp.int32) % t_out_pad
    edge_mask = jnp.stack(
        [(t_idx != 0).astype(jnp.float32),
         (t_idx < t_out - 1).astype(jnp.float32)], axis=1)        # (n_rows, 2)

    # block-diagonal attention bias (also masks padded-time key columns)
    blk = jnp.arange(n_rows, dtype=jnp.int32) // t_out_pad
    key_ok = (blk[None, :] == blk[:, None]) & (t_idx[None, :] < t_out)
    attn_bias = jnp.where(key_ok, 0.0, -1e30).astype(jnp.float32)  # (N, N)

    def const_spec(arr):
        z = (0,) * arr.ndim
        return pl.BlockSpec(arr.shape, lambda b, _z=z: _z)

    in_specs = [
        pl.BlockSpec((bt, G, stride * c_in), lambda b: (b, 0, 0)),
        const_spec(w1), const_spec(wsc), const_spec(shifts), const_spec(w2),
        const_spec(edge_mask), const_spec(pe_full), const_spec(attn_bias),
        const_spec(wqkv), const_spec(bqkv), const_spec(wo), const_spec(bo),
    ]
    out_specs = pl.BlockSpec((bt, t_out_pad, d_out), lambda b: (b, 0, 0))

    kernel = _build_kernel(c_in=c_in, c_out=c_out, d_out=d_out, stride=stride,
                           t_out_pad=t_out_pad, bt=bt)

    out = pl.pallas_call(
        kernel,
        out_shape=jax.ShapeDtypeStruct((b_pad, t_out_pad, d_out), jnp.float32),
        grid_spec=pltpu.PrefetchScalarGridSpec(
            num_scalar_prefetch=0, grid=(b_pad // bt,),
            in_specs=in_specs, out_specs=out_specs),
        compiler_params=pltpu.CompilerParams(
            dimension_semantics=("parallel",),            # batch axis independent
            vmem_limit_bytes=32 * 1024 * 1024),           # explicit v7x-safe budget
    )(x_g, w1, wsc, shifts, w2, edge_mask, pe_full, attn_bias,
      wqkv, bqkv, wo, bo)

    out = out[:B, :t_out]                                 # drop batch/time padding
    # transpose(1,2) + unsqueeze(3): (B, T_out, D) -> (B, D, T_out, 1)
    return jnp.transpose(out, (0, 2, 1))[..., None]


def init_params(key, c_in, c_out, output_dim, max_len):
    ks = jax.random.split(key, 10)
    eps = 1e-5
    bn_scale = 1.0 / math.sqrt(1.0 + eps)   # gamma=1, running_var=1 (default init)
    bn_shift = 0.0                          # beta=0, running_mean=0

    # conv weights: PyTorch (c_out, c_in, 3, 1) -> (3, c_in, c_out), BN folded
    w1_t = 0.1 * jax.random.normal(ks[0], (c_out, c_in, 3, 1), jnp.float32)
    w1 = jnp.transpose(w1_t[..., 0], (2, 1, 0)) * bn_scale
    w2_t = 0.1 * jax.random.normal(ks[1], (c_out, c_out, 3, 1), jnp.float32)
    w2 = jnp.transpose(w2_t[..., 0], (2, 1, 0)) * bn_scale
    wsc_t = 0.1 * jax.random.normal(ks[2], (c_out, c_in, 1, 1), jnp.float32)
    wsc = jnp.transpose(wsc_t[:, :, 0, 0], (1, 0)) * bn_scale

    s1 = jnp.full((1, c_out), bn_shift, jnp.float32)
    s2 = jnp.full((1, c_out), bn_shift, jnp.float32)
    ssc = jnp.full((1, c_out), bn_shift, jnp.float32)

    # attention projections (share_weight=False -> separate Wq/Wk/Wv)
    wq = 0.1 * jax.random.normal(ks[3], (c_out, c_out), jnp.float32)
    wk = 0.1 * jax.random.normal(ks[4], (c_out, c_out), jnp.float32)
    wv = 0.1 * jax.random.normal(ks[5], (c_out, c_out), jnp.float32)
    wo = 0.1 * jax.random.normal(ks[6], (c_out, output_dim), jnp.float32)
    bq = 0.01 * jax.random.normal(ks[7], (1, c_out), jnp.float32)
    bk = 0.01 * jax.random.normal(ks[8], (1, c_out), jnp.float32)
    bv = 0.01 * jax.random.normal(ks[9], (1, c_out), jnp.float32)
    bo = jnp.zeros((1, output_dim), jnp.float32)

    # sinusoidal positional-encoding table (max_len, d_model=c_out)
    pos = jnp.arange(max_len, dtype=jnp.float32)[:, None]
    div = jnp.exp(jnp.arange(0, c_out, 2, dtype=jnp.float32)
                  * (-math.log(10000.0) / c_out))
    pe = jnp.zeros((max_len, c_out), jnp.float32)
    pe = pe.at[:, 0::2].set(jnp.sin(pos * div))
    pe = pe.at[:, 1::2].set(jnp.cos(pos * div))

    return dict(w1=w1, s1=s1, w2=w2, s2=s2, wsc=wsc, ssc=ssc, pe_table=pe,
                wq=wq, bq=bq, wk=wk, bk=bk, wv=wv, bv=bv, wo=wo, bo=bo)


def _reference(x_nchw, params, stride):
    """Plain-JAX f32 mirror of the forward pass, for correctness checking."""
    x = jnp.transpose(x_nchw[..., 0], (0, 2, 1))
    B, T, c_in = x.shape
    t_out = (T + 2 - 3) // stride + 1
    xpad = jnp.pad(x, ((0, 0), (1, 1), (0, 0)))
    hi = stride * (t_out - 1) + 1
    h1 = sum(jnp.einsum('btc,cd->btd', xpad[:, k:k + hi:stride], params["w1"][k])
             for k in range(3)) + params["s1"]
    h1 = jnp.maximum(h1, 0.0)
    h1p = jnp.pad(h1, ((0, 0), (1, 1), (0, 0)))
    h2 = sum(jnp.einsum('btc,cd->btd', h1p[:, k:k + t_out], params["w2"][k])
             for k in range(3)) + params["s2"]
    res = jnp.einsum('btc,cd->btd', xpad[:, 1:1 + hi:stride],
                     params["wsc"]) + params["ssc"]
    y = jnp.maximum(h2 + res, 0.0) + params["pe_table"][:t_out]
    q = y @ params["wq"] + params["bq"]
    k_ = y @ params["wk"] + params["bk"]
    v = y @ params["wv"] + params["bv"]
    c_out = q.shape[-1]
    attn = jax.nn.softmax(jnp.einsum('bqd,bkd->bqk', q, k_) / math.sqrt(c_out), -1)
    out = jnp.einsum('bqk,bkd->bqd', attn, v) @ params["wo"] + params["bo"]
    return jnp.transpose(out, (0, 2, 1))[..., None]


if __name__ == "__main__":
    B, C_IN, C_OUT, T, S = 3, 4, 16, 16, 2
    MAX_LEN, OUTPUT_DIM = 64, 32

    key = jax.random.PRNGKey(0)
    pkey, xkey = jax.random.split(key)
    params = init_params(pkey, C_IN, C_OUT, OUTPUT_DIM, MAX_LEN)
    x = jax.random.normal(xkey, (B, C_IN, T, 1), jnp.float32)

    out = jax.block_until_ready(lgblock_forward(x, params, stride=S))

    t_out = (T + 2 - 3) // S + 1
    assert out.shape == (B, OUTPUT_DIM, t_out, 1), out.shape

    ref = _reference(x, params, S)
    err = float(jnp.max(jnp.abs(out - ref)))
    # bf16 MXU operands (f32 accumulation) vs the pure-f32 reference ->
    # ~1e-2-level absolute deviation is expected; 2e-2 is a comfortable bound.
    assert jnp.allclose(out, ref, atol=2e-2, rtol=2e-2), err

    print("KERNEL_OK")
</pallas_src>

<mosaic_0001>
module attributes {stable_mosaic.version = 11 : i64} {
  func.func @kernel(%arg0: i32, %arg1: memref<16x9x8xbf16, #tpu.memory_space<vmem>>, %arg2: memref<3x4x16xbf16, #tpu.memory_space<vmem>>, %arg3: memref<4x16xbf16, #tpu.memory_space<vmem>>, %arg4: memref<3x16xf32, #tpu.memory_space<vmem>>, %arg5: memref<3x16x16xbf16, #tpu.memory_space<vmem>>, %arg6: memref<128x2xf32, #tpu.memory_space<vmem>>, %arg7: memref<128x16xf32, #tpu.memory_space<vmem>>, %arg8: memref<128x128xf32, #tpu.memory_space<vmem>>, %arg9: memref<16x48xbf16, #tpu.memory_space<vmem>>, %arg10: memref<1x48xf32, #tpu.memory_space<vmem>>, %arg11: memref<16x32xbf16, #tpu.memory_space<vmem>>, %arg12: memref<1x32xf32, #tpu.memory_space<vmem>>, %arg13: memref<16x8x32xf32, #tpu.memory_space<vmem>>) attributes {dimension_semantics = [#tpu.dimension_semantics<parallel>], iteration_bounds = array<i64: 1>, scalar_prefetch = 0 : i64, scratch_operands = 0 : i64, tpu.core_type = #tpu.core_type<tc>, window_params = [{transform_indices = @transform_0, window_bounds = array<i64: 16, 9, 8>}, {pipeline_mode = #tpu.pipeline_mode<synchronous>, transform_indices = @transform_1, window_bounds = array<i64: 3, 4, 16>}, {pipeline_mode = #tpu.pipeline_mode<synchronous>, transform_indices = @transform_2, window_bounds = array<i64: 4, 16>}, {pipeline_mode = #tpu.pipeline_mode<synchronous>, transform_indices = @transform_3, window_bounds = array<i64: 3, 16>}, {pipeline_mode = #tpu.pipeline_mode<synchronous>, transform_indices = @transform_4, window_bounds = array<i64: 3, 16, 16>}, {pipeline_mode = #tpu.pipeline_mode<synchronous>, transform_indices = @transform_5, window_bounds = array<i64: 128, 2>}, {pipeline_mode = #tpu.pipeline_mode<synchronous>, transform_indices = @transform_6, window_bounds = array<i64: 128, 16>}, {pipeline_mode = #tpu.pipeline_mode<synchronous>, transform_indices = @transform_7, window_bounds = array<i64: 128, 128>}, {pipeline_mode = #tpu.pipeline_mode<synchronous>, transform_indices = @transform_8, window_bounds = array<i64: 16, 48>}, {pipeline_mode = #tpu.pipeline_mode<synchronous>, transform_indices = @transform_9, window_bounds = array<i64: 1, 48>}, {pipeline_mode = #tpu.pipeline_mode<synchronous>, transform_indices = @transform_10, window_bounds = array<i64: 16, 32>}, {pipeline_mode = #tpu.pipeline_mode<synchronous>, transform_indices = @transform_11, window_bounds = array<i64: 1, 32>}, {transform_indices = @transform_12, window_bounds = array<i64: 16, 8, 32>}]} {
    %c0 = arith.constant 0 : index
    %c0_0 = arith.constant 0 : index
    %c0_1 = arith.constant 0 : index
    %0 = vector.load %arg1[%c0, %c0_0, %c0_1] : memref<16x9x8xbf16, #tpu.memory_space<vmem>>, vector<16x9x8xbf16>
    %1 = vector.extract_strided_slice %0 {offsets = [0, 0, 0], sizes = [16, 8, 4], strides = [1, 1, 1]} : vector<16x9x8xbf16> to vector<16x8x4xbf16>
    %2 = vector.shape_cast %1 : vector<16x8x4xbf16> to vector<128x4xbf16>
    %3 = vector.extract_strided_slice %0 {offsets = [0, 0, 4], sizes = [16, 8, 4], strides = [1, 1, 1]} : vector<16x9x8xbf16> to vector<16x8x4xbf16>
    %4 = vector.shape_cast %3 : vector<16x8x4xbf16> to vector<128x4xbf16>
    %5 = vector.extract_strided_slice %0 {offsets = [0, 1, 0], sizes = [16, 8, 4], strides = [1, 1, 1]} : vector<16x9x8xbf16> to vector<16x8x4xbf16>
    %6 = vector.shape_cast %5 : vector<16x8x4xbf16> to vector<128x4xbf16>
    %c0_2 = arith.constant 0 : index
    %c0_3 = arith.constant 0 : index
    %c0_4 = arith.constant 0 : index
    %7 = vector.load %arg2[%c0_2, %c0_3, %c0_4] : memref<3x4x16xbf16, #tpu.memory_space<vmem>>, vector<1x4x16xbf16>
    %8 = vector.shape_cast %7 : vector<1x4x16xbf16> to vector<4x16xbf16>
    %cst = arith.constant dense<0.000000e+00> : vector<128x16xf32>
    %9 = tpu.matmul %2, %8, %cst {dimension_numbers = #tpu.dot_dimension_numbers<[1], [0], [0], [1], [0, 0, 1, 1], [], []>} : vector<128x4xbf16>, vector<4x16xbf16>, vector<128x16xf32> -> vector<128x16xf32>
    %c1 = arith.constant 1 : index
    %c0_5 = arith.constant 0 : index
    %c0_6 = arith.constant 0 : index
    %10 = vector.load %arg2[%c1, %c0_5, %c0_6] : memref<3x4x16xbf16, #tpu.memory_space<vmem>>, vector<1x4x16xbf16>
    %11 = vector.shape_cast %10 : vector<1x4x16xbf16> to vector<4x16xbf16>
    %cst_7 = arith.constant dense<0.000000e+00> : vector<128x16xf32>
    %12 = tpu.matmul %4, %11, %cst_7 {dimension_numbers = #tpu.dot_dimension_numbers<[1], [0], [0], [1], [0, 0, 1, 1], [], []>} : vector<128x4xbf16>, vector<4x16xbf16>, vector<128x16xf32> -> vector<128x16xf32>
    %13 = arith.addf %9, %12 : vector<128x16xf32>
    %c2 = arith.constant 2 : index
    %c0_8 = arith.constant 0 : index
    %c0_9 = arith.constant 0 : index
    %14 = vector.load %arg2[%c2, %c0_8, %c0_9] : memref<3x4x16xbf16, #tpu.memory_space<vmem>>, vector<1x4x16xbf16>
    %15 = vector.shape_cast %14 : vector<1x4x16xbf16> to vector<4x16xbf16>
    %cst_10 = arith.constant dense<0.000000e+00> : vector<128x16xf32>
    %16 = tpu.matmul %6, %15, %cst_10 {dimension_numbers = #tpu.dot_dimension_numbers<[1], [0], [0], [1], [0, 0, 1, 1], [], []>} : vector<128x4xbf16>, vector<4x16xbf16>, vector<128x16xf32> -> vector<128x16xf32>
    %17 = arith.addf %13, %16 : vector<128x16xf32>
    %c0_11 = arith.constant 0 : index
    %c0_12 = arith.constant 0 : index
    %18 = vector.load %arg4[%c0_11, %c0_12] : memref<3x16xf32, #tpu.memory_space<vmem>>, vector<1x16xf32>
    %19 = vector.broadcast %18 : vector<1x16xf32> to vector<128x16xf32>
    %20 = arith.addf %17, %19 : vector<128x16xf32>
    %cst_13 = arith.constant 0.000000e+00 : f32
    %21 = vector.broadcast %cst_13 : f32 to vector<128x16xf32>
    %22 = arith.maximumf %20, %21 : vector<128x16xf32>
    %c0_14 = arith.constant 0 : index
    %c0_15 = arith.constant 0 : index
    %23 = vector.load %arg3[%c0_14, %c0_15] : memref<4x16xbf16, #tpu.memory_space<vmem>>, vector<4x16xbf16>
    %cst_16 = arith.constant dense<0.000000e+00> : vector<128x16xf32>
    %24 = tpu.matmul %4, %23, %cst_16 {dimension_numbers = #tpu.dot_dimension_numbers<[1], [0], [0], [1], [0, 0, 1, 1], [], []>} : vector<128x4xbf16>, vector<4x16xbf16>, vector<128x16xf32> -> vector<128x16xf32>
    %c2_17 = arith.constant 2 : index
    %c0_18 = arith.constant 0 : index
    %25 = vector.load %arg4[%c2_17, %c0_18] : memref<3x16xf32, #tpu.memory_space<vmem>>, vector<1x16xf32>
    %26 = vector.broadcast %25 : vector<1x16xf32> to vector<128x16xf32>
    %27 = arith.addf %24, %26 : vector<128x16xf32>
    %c1_i32 = arith.constant 1 : i32
    %28 = tpu.dynamic_rotate %22 by %c1_i32 dim 0 : vector<128x16xf32>, i32 -> vector<128x16xf32>
    %c0_19 = arith.constant 0 : index
    %c0_20 = arith.constant 0 : index
    %29 = vector.load %arg6[%c0_19, %c0_20] : memref<128x2xf32, #tpu.memory_space<vmem>>, vector<128x1xf32>
    %30 = vector.broadcast %29 : vector<128x1xf32> to vector<128x16xf32>
    %31 = arith.mulf %28, %30 : vector<128x16xf32>
    %c127_i32 = arith.constant 127 : i32
    %32 = tpu.dynamic_rotate %22 by %c127_i32 dim 0 : vector<128x16xf32>, i32 -> vector<128x16xf32>
    %c0_21 = arith.constant 0 : index
    %c1_22 = arith.constant 1 : index
    %33 = vector.load %arg6[%c0_21, %c1_22] : memref<128x2xf32, #tpu.memory_space<vmem>>, vector<128x1xf32>
    %34 = vector.broadcast %33 : vector<128x1xf32> to vector<128x16xf32>
    %35 = arith.mulf %32, %34 : vector<128x16xf32>
    %36 = arith.truncf %31 : vector<128x16xf32> to vector<128x16xbf16>
    %c0_23 = arith.constant 0 : index
    %c0_24 = arith.constant 0 : index
    %c0_25 = arith.constant 0 : index
    %37 = vector.load %arg5[%c0_23, %c0_24, %c0_25] : memref<3x16x16xbf16, #tpu.memory_space<vmem>>, vector<1x16x16xbf16>
    %38 = vector.shape_cast %37 : vector<1x16x16xbf16> to vector<16x16xbf16>
    %cst_26 = arith.constant dense<0.000000e+00> : vector<128x16xf32>
    %39 = tpu.matmul %36, %38, %cst_26 {dimension_numbers = #tpu.dot_dimension_numbers<[1], [0], [0], [1], [0, 0, 1, 1], [], []>} : vector<128x16xbf16>, vector<16x16xbf16>, vector<128x16xf32> -> vector<128x16xf32>
    %40 = arith.truncf %22 : vector<128x16xf32> to vector<128x16xbf16>
    %c1_27 = arith.constant 1 : index
    %c0_28 = arith.constant 0 : index
    %c0_29 = arith.constant 0 : index
    %41 = vector.load %arg5[%c1_27, %c0_28, %c0_29] : memref<3x16x16xbf16, #tpu.memory_space<vmem>>, vector<1x16x16xbf16>
    %42 = vector.shape_cast %41 : vector<1x16x16xbf16> to vector<16x16xbf16>
    %cst_30 = arith.constant dense<0.000000e+00> : vector<128x16xf32>
    %43 = tpu.matmul %40, %42, %cst_30 {dimension_numbers = #tpu.dot_dimension_numbers<[1], [0], [0], [1], [0, 0, 1, 1], [], []>} : vector<128x16xbf16>, vector<16x16xbf16>, vector<128x16xf32> -> vector<128x16xf32>
    %44 = arith.addf %39, %43 : vector<128x16xf32>
    %45 = arith.truncf %35 : vector<128x16xf32> to vector<128x16xbf16>
    %c2_31 = arith.constant 2 : index
    %c0_32 = arith.constant 0 : index
    %c0_33 = arith.constant 0 : index
    %46 = vector.load %arg5[%c2_31, %c0_32, %c0_33] : memref<3x16x16xbf16, #tpu.memory_space<vmem>>, vector<1x16x16xbf16>
    %47 = vector.shape_cast %46 : vector<1x16x16xbf16> to vector<16x16xbf16>
    %cst_34 = arith.constant dense<0.000000e+00> : vector<128x16xf32>
    %48 = tpu.matmul %45, %47, %cst_34 {dimension_numbers = #tpu.dot_dimension_numbers<[1], [0], [0], [1], [0, 0, 1, 1], [], []>} : vector<128x16xbf16>, vector<16x16xbf16>, vector<128x16xf32> -> vector<128x16xf32>
    %49 = arith.addf %44, %48 : vector<128x16xf32>
    %c1_35 = arith.constant 1 : index
    %c0_36 = arith.constant 0 : index
    %50 = vector.load %arg4[%c1_35, %c0_36] : memref<3x16xf32, #tpu.memory_space<vmem>>, vector<1x16xf32>
    %51 = vector.broadcast %50 : vector<1x16xf32> to vector<128x16xf32>
    %52 = arith.addf %49, %51 : vector<128x16xf32>
    %53 = arith.addf %52, %27 : vector<128x16xf32>
    %cst_37 = arith.constant 0.000000e+00 : f32
    %54 = vector.broadcast %cst_37 : f32 to vector<128x16xf32>
    %55 = arith.maximumf %53, %54 : vector<128x16xf32>
    %c0_38 = arith.constant 0 : index
    %c0_39 = arith.constant 0 : index
    %56 = vector.load %arg7[%c0_38, %c0_39] : memref<128x16xf32, #tpu.memory_space<vmem>>, vector<128x16xf32>
    %57 = arith.addf %55, %56 : vector<128x16xf32>
    %58 = arith.truncf %57 : vector<128x16xf32> to vector<128x16xbf16>
    %c0_40 = arith.constant 0 : index
    %c0_41 = arith.constant 0 : index
    %59 = vector.load %arg9[%c0_40, %c0_41] : memref<16x48xbf16, #tpu.memory_space<vmem>>, vector<16x48xbf16>
    %cst_42 = arith.constant dense<0.000000e+00> : vector<128x48xf32>
    %60 = tpu.matmul %58, %59, %cst_42 {dimension_numbers = #tpu.dot_dimension_numbers<[1], [0], [0], [1], [0, 0, 1, 1], [], []>} : vector<128x16xbf16>, vector<16x48xbf16>, vector<128x48xf32> -> vector<128x48xf32>
    %c0_43 = arith.constant 0 : index
    %c0_44 = arith.constant 0 : index
    %61 = vector.load %arg10[%c0_43, %c0_44] : memref<1x48xf32, #tpu.memory_space<vmem>>, vector<1x48xf32>
    %62 = vector.broadcast %61 : vector<1x48xf32> to vector<128x48xf32>
    %63 = arith.addf %60, %62 : vector<128x48xf32>
    %64 = vector.extract_strided_slice %63 {offsets = [0, 0], sizes = [128, 16], strides = [1, 1]} : vector<128x48xf32> to vector<128x16xf32>
    %65 = arith.truncf %64 : vector<128x16xf32> to vector<128x16xbf16>
    %66 = vector.extract_strided_slice %63 {offsets = [0, 16], sizes = [128, 16], strides = [1, 1]} : vector<128x48xf32> to vector<128x16xf32>
    %67 = arith.truncf %66 : vector<128x16xf32> to vector<128x16xbf16>
    %68 = vector.extract_strided_slice %63 {offsets = [0, 32], sizes = [128, 16], strides = [1, 1]} : vector<128x48xf32> to vector<128x16xf32>
    %69 = arith.truncf %68 : vector<128x16xf32> to vector<128x16xbf16>
    %cst_45 = arith.constant dense<0.000000e+00> : vector<128x128xf32>
    %70 = tpu.matmul %65, %67, %cst_45 {dimension_numbers = #tpu.dot_dimension_numbers<[1], [1], [0], [0], [0, 0, 1, 0], [], []>} : vector<128x16xbf16>, vector<128x16xbf16>, vector<128x128xf32> -> vector<128x128xf32>
    %c0_46 = arith.constant 0 : index
    %c0_47 = arith.constant 0 : index
    %71 = vector.load %arg8[%c0_46, %c0_47] : memref<128x128xf32, #tpu.memory_space<vmem>>, vector<128x128xf32>
    %72 = arith.addf %70, %71 : vector<128x128xf32>
    %cst_48 = arith.constant dense<0xFF800000> : vector<128xf32>
    %73 = vector.multi_reduction <maximumf>, %72, %cst_48 [1] : vector<128x128xf32> to vector<128xf32>
    %74 = vector.shape_cast %73 : vector<128xf32> to vector<128x1xf32>
    %75 = vector.broadcast %74 : vector<128x1xf32> to vector<128x128xf32>
    %76 = arith.subf %72, %75 : vector<128x128xf32>
    %77 = math.exp %76 : vector<128x128xf32>
    %cst_49 = arith.constant dense<0.000000e+00> : vector<128xf32>
    %78 = vector.multi_reduction <add>, %77, %cst_49 [1] : vector<128x128xf32> to vector<128xf32>
    %79 = vector.shape_cast %78 : vector<128xf32> to vector<128x1xf32>
    %80 = tpu.reciprocal %79 : vector<128x1xf32> -> vector<128x1xf32>
    %81 = vector.broadcast %80 : vector<128x1xf32> to vector<128x128xf32>
    %82 = arith.mulf %77, %81 : vector<128x128xf32>
    %83 = arith.truncf %82 : vector<128x128xf32> to vector<128x128xbf16>
    %cst_50 = arith.constant dense<0.000000e+00> : vector<128x16xf32>
    %84 = tpu.matmul %83, %69, %cst_50 {dimension_numbers = #tpu.dot_dimension_numbers<[1], [0], [0], [1], [0, 0, 1, 1], [], []>} : vector<128x128xbf16>, vector<128x16xbf16>, vector<128x16xf32> -> vector<128x16xf32>
    %85 = arith.truncf %84 : vector<128x16xf32> to vector<128x16xbf16>
    %c0_51 = arith.constant 0 : index
    %c0_52 = arith.constant 0 : index
    %86 = vector.load %arg11[%c0_51, %c0_52] : memref<16x32xbf16, #tpu.memory_space<vmem>>, vector<16x32xbf16>
    %cst_53 = arith.constant dense<0.000000e+00> : vector<128x32xf32>
    %87 = tpu.matmul %85, %86, %cst_53 {dimension_numbers = #tpu.dot_dimension_numbers<[1], [0], [0], [1], [0, 0, 1, 1], [], []>} : vector<128x16xbf16>, vector<16x32xbf16>, vector<128x32xf32> -> vector<128x32xf32>
    %c0_54 = arith.constant 0 : index
    %c0_55 = arith.constant 0 : index
    %88 = vector.load %arg12[%c0_54, %c0_55] : memref<1x32xf32, #tpu.memory_space<vmem>>, vector<1x32xf32>
    %89 = vector.broadcast %88 : vector<1x32xf32> to vector<128x32xf32>
    %90 = arith.addf %87, %89 : vector<128x32xf32>
    %91 = vector.shape_cast %90 : vector<128x32xf32> to vector<16x8x32xf32>
    %c0_56 = arith.constant 0 : index
    %c0_57 = arith.constant 0 : index
    %c0_58 = arith.constant 0 : index
    %92 = vector.load %arg13[%c0_56, %c0_57, %c0_58] : memref<16x8x32xf32, #tpu.memory_space<vmem>>, vector<16x8x32xf32>
    tpu.vector_store %arg13[%c0_56, %c0_57, %c0_58], %91 {strides = array<i32>} : memref<16x8x32xf32, #tpu.memory_space<vmem>>, vector<16x8x32xf32>,
    return
  }
  func.func @transform_0(%arg0: i32) -> (i32, i32, i32) {
    %c0_i32 = arith.constant 0 : i32
    %c0_i32_0 = arith.constant 0 : i32
    %c0_i32_1 = arith.constant 0 : i32
    return %arg0, %c0_i32, %c0_i32_0 : i32, i32, i32
  }
  func.func @transform_1(%arg0: i32) -> (i32, i32, i32) {
    %c0_i32 = arith.constant 0 : i32
    %c0_i32_0 = arith.constant 0 : i32
    %c0_i32_1 = arith.constant 0 : i32
    %c0_i32_2 = arith.constant 0 : i32
    return %c0_i32, %c0_i32_0, %c0_i32_1 : i32, i32, i32
  }
  func.func @transform_2(%arg0: i32) -> (i32, i32) {
    %c0_i32 = arith.constant 0 : i32
    %c0_i32_0 = arith.constant 0 : i32
    %c0_i32_1 = arith.constant 0 : i32
    return %c0_i32, %c0_i32_0 : i32, i32
  }
  func.func @transform_3(%arg0: i32) -> (i32, i32) {
    %c0_i32 = arith.constant 0 : i32
    %c0_i32_0 = arith.constant 0 : i32
    %c0_i32_1 = arith.constant 0 : i32
    return %c0_i32, %c0_i32_0 : i32, i32
  }
  func.func @transform_4(%arg0: i32) -> (i32, i32, i32) {
    %c0_i32 = arith.constant 0 : i32
    %c0_i32_0 = arith.constant 0 : i32
    %c0_i32_1 = arith.constant 0 : i32
    %c0_i32_2 = arith.constant 0 : i32
    return %c0_i32, %c0_i32_0, %c0_i32_1 : i32, i32, i32
  }
  func.func @transform_5(%arg0: i32) -> (i32, i32) {
    %c0_i32 = arith.constant 0 : i32
    %c0_i32_0 = arith.constant 0 : i32
    %c0_i32_1 = arith.constant 0 : i32
    return %c0_i32, %c0_i32_0 : i32, i32
  }
  func.func @transform_6(%arg0: i32) -> (i32, i32) {
    %c0_i32 = arith.constant 0 : i32
    %c0_i32_0 = arith.constant 0 : i32
    %c0_i32_1 = arith.constant 0 : i32
    return %c0_i32, %c0_i32_0 : i32, i32
  }
  func.func @transform_7(%arg0: i32) -> (i32, i32) {
    %c0_i32 = arith.constant 0 : i32
    %c0_i32_0 = arith.constant 0 : i32
    %c0_i32_1 = arith.constant 0 : i32
    return %c0_i32, %c0_i32_0 : i32, i32
  }
  func.func @transform_8(%arg0: i32) -> (i32, i32) {
    %c0_i32 = arith.constant 0 : i32
    %c0_i32_0 = arith.constant 0 : i32
    %c0_i32_1 = arith.constant 0 : i32
    return %c0_i32, %c0_i32_0 : i32, i32
  }
  func.func @transform_9(%arg0: i32) -> (i32, i32) {
    %c0_i32 = arith.constant 0 : i32
    %c0_i32_0 = arith.constant 0 : i32
    %c0_i32_1 = arith.constant 0 : i32
    return %c0_i32, %c0_i32_0 : i32, i32
  }
  func.func @transform_10(%arg0: i32) -> (i32, i32) {
    %c0_i32 = arith.constant 0 : i32
    %c0_i32_0 = arith.constant 0 : i32
    %c0_i32_1 = arith.constant 0 : i32
    return %c0_i32, %c0_i32_0 : i32, i32
  }
  func.func @transform_11(%arg0: i32) -> (i32, i32) {
    %c0_i32 = arith.constant 0 : i32
    %c0_i32_0 = arith.constant 0 : i32
    %c0_i32_1 = arith.constant 0 : i32
    return %c0_i32, %c0_i32_0 : i32, i32
  }
  func.func @transform_12(%arg0: i32) -> (i32, i32, i32) {
    %c0_i32 = arith.constant 0 : i32
    %c0_i32_0 = arith.constant 0 : i32
    %c0_i32_1 = arith.constant 0 : i32
    return %arg0, %c0_i32, %c0_i32_0 : i32, i32, i32
  }
}

</mosaic_0001>

<bundles_post_ra>
// kernel: tpu_custom_call.1
= control target key start
LH: loop header
LB: loop body
LE: loop exit
PB: predicated region body
PF: predicated region fallthrough
CT: control target
= control target key end

     0   :  { %vm386_vm0 = vcmask 1041408   ;;  %s2429_s15 = smov 124   ;;  %vm75_vm1 = vsmask.f32 3328  ;;  %vm76_vm2 = vsmask.f32 7440  ;;  %s3584_s0 = inlined_call_operand.vmem [shape: bf16[16,9,8], index: 0, kind: input, shape index: {}]   ;;  %s3585_s1 = inlined_call_operand.vmem [shape: bf16[3,4,16], index: 1, kind: input, shape index: {}]   ;;  %s3586_s2 = inlined_call_operand.vmem [shape: bf16[4,16], index: 2, kind: input, shape index: {}]   ;;  %s3587_s3 = inlined_call_operand.vmem [shape: f32[3,16], index: 3, kind: input, shape index: {}]   ;;  %s3588_s4 = inlined_call_operand.vmem [shape: bf16[3,16,16], index: 4, kind: input, shape index: {}]   ;;  %s3589_s5 = inlined_call_operand.vmem [shape: f32[128,2], index: 5, kind: input, shape index: {}]   ;;  %s3590_s6 = inlined_call_operand.vmem [shape: f32[128,16], index: 6, kind: input, shape index: {}]   ;;  %s3591_s7 = inlined_call_operand.vmem [shape: f32[128,128], index: 7, kind: input, shape index: {}]   ;;  %s3592_s8 = inlined_call_operand.vmem [shape: bf16[16,48], index: 8, kind: input, shape index: {}]   ;;  %s3593_s9 = inlined_call_operand.vmem [shape: f32[1,48], index: 9, kind: input, shape index: {}]   ;;  %s3594_s10 = inlined_call_operand.vmem [shape: bf16[16,32], index: 10, kind: input, shape index: {}]   ;;  %s3595_s11 = inlined_call_operand.vmem [shape: f32[1,32], index: 11, kind: input, shape index: {}]   ;;  %s3596_s12 = inlined_call_operand.hbm [shape: f32[16,8,32], index: 12, kind: output, shape index: {}]  }
   0x1   :  { %v2152_v0 = vld [vmem:[%s3584_s0] sm:$0xf]  ;;  %v2287_v1 = vld [vmem:[%s3584_s0 + $0x4] sm:$0xf0]  ;;  %v2156_v4 = vld [vmem:[%s3584_s0 + $0x10] sm:$0xf] }
   0x2   :  { %v2508_v2 = vor.u32 %v2287_v1, %v2152_v0  ;;  %v2160_v3 = vld [vmem:[%s3584_s0 + $0x20] sm:$0xf]  ;;  %v2288_v5 = vld [vmem:[%s3584_s0 + $0x14] sm:$0xf0]  ;;  %v2289_v6 = vld [vmem:[%s3584_s0 + $0x24] sm:$0xf0] }
   0x3   :  { %v2524_v7 = vor.u32 %v2289_v6, %v2160_v3  ;;  %v2198_v8 = vld [vmem:[%s3585_s1 + $0x4] sm:$0x3]  ;;  %v67_v9 = vld [vmem:[%s3584_s0 + $0x60] sm:$0xf]  ;;  %v2164_v11 = vld [vmem:[%s3584_s0 + $0x30] sm:$0xf]  ;;  %v2553_v24 = vor.u32 %v2288_v5, %v2156_v4 }
   0x4   :  { %345 = vrot.lane.b32.xlu0 %v2508_v2, %s2429_s15  ;;  %v68_v10 = vld [vmem:[%s3584_s0 + $0x64] sm:$0x1]  ;;  %v566_v12 = vsel %vm386_vm0, %v2198_v8, 0  ;;  %v69_v13 = vld [vmem:[%s3584_s0 + $0x68] sm:$0xf]  ;;  %v247_v15 = vshrl.u32 %v67_v9, 16  ;;  %vm2576_vm4 = vmor %vm75_vm1, %vm76_vm2 }
   0x5   :  { %v70_v14 = vld [vmem:[%s3584_s0 + $0x6c] sm:$0x1]  ;;  %349 = vrot.lane.b32.xlu1 %v2524_v7, %s2429_s15  ;;  %v2290_v16 = vld [vmem:[%s3584_s0 + $0x34] sm:$0xf0]  ;;  %2301 = vmatpush.bf16.msra.mxu3 %v566_v12  ;;  %v250_v17 = vshll.u32 %v67_v9, 16  ;;  %v256_v18 = vshll.u32 %v68_v10, 16 }
   0x6   :  { %v249_v19 = vrot.slane %v247_v15, 4  ;;  %v261_v20 = vshrl.u32 %v69_v13, 16  ;;  %v264_v21 = vshll.u32 %v69_v13, 16  ;;  %v270_v22 = vshll.u32 %v70_v14, 16  ;;  %v2168_v23 = vld [vmem:[%s3584_s0 + $0x40] sm:$0xf]  ;;  %575 = vmatpush.bf16.msra.mxu2 %v566_v12 }
   0x7   :  { %v252_v25 = vrot.slane %v250_v17, 5  ;;  %v258_v26 = vrot.slane %v256_v18, 5  ;;  %v2291_v27 = vld [vmem:[%s3584_s0 + $0x44] sm:$0xf0]  ;;  %vm361_vm3 = vcmask 31744   ;;  %v2563_v33 = vor.u32 %v2290_v16, %v2164_v11 }
   0x8   :  { %v263_v28 = vrot.slane %v261_v20, 4  ;;  %v266_v29 = vrot.slane %v264_v21, 5  ;;  %v272_v30 = vrot.slane %v270_v22, 5  ;;  %v2558_v31 = vor.u32 %v2291_v27, %v2168_v23  ;;  %v2176_v32 = vld [vmem:[%s3584_s0 + $0x60] sm:$0xf] }
   0x9   :  { %v253_v34 = vor.u32 %v252_v25, %v249_v19  ;;  %v2293_v35 = vld [vmem:[%s3584_s0 + $0x64] sm:$0xf0]  ;;  %v71_v36 = vld [vmem:[%s3584_s0 + $0x70] sm:$0xf]  ;;  %v72_v37 = vld [vmem:[%s3584_s0 + $0x74] sm:$0x1] }
   0xa   :  { %v267_v39 = vor.u32 %v266_v29, %v263_v28  ;;  %353 = vrot.lane.b32.xlu2 %v2558_v31, %s2429_s15  ;;  %v2582_v40 = vor.u32 %v2293_v35, %v2176_v32  ;;  %v73_v41 = vld [vmem:[%s3584_s0 + $0x78] sm:$0xf]  ;;  %v74_v42 = vld [vmem:[%s3584_s0 + $0x7c] sm:$0x1]  ;;  %v275_v43 = vshrl.u32 %v71_v36, 16  ;;  %v278_v44 = vshll.u32 %v71_v36, 16 }
   0xb   :  { %v254_v45 = vrot.slane %v253_v34, 4  ;;  %v284_v46 = vshll.u32 %v72_v37, 16  ;;  %v289_v47 = vshrl.u32 %v73_v41, 16  ;;  %v292_v48 = vshll.u32 %v73_v41, 16  ;;  %v2172_v49 = vld [vmem:[%s3584_s0 + $0x50] sm:$0xf] }
   0xc   :  { %347 = vrot.lane.b32.xlu0 %v2553_v24, %s2429_s15  ;;  %v268_v50 = vrot.slane %v267_v39, 4  ;;  %v277_v51 = vrot.slane %v275_v43, 4  ;;  %v280_v52 = vrot.slane %v278_v44, 5  ;;  %v298_v53 = vshll.u32 %v74_v42, 16  ;;  %v2292_v54 = vld [vmem:[%s3584_s0 + $0x54] sm:$0xf0] }
   0xd   :  { %351 = vrot.lane.b32.xlu1 %v2563_v33, %s2429_s15  ;;  %v259_v55 = vsel %vm2576_vm4, %v254_v45, %v258_v26  ;;  %v286_v56 = vrot.slane %v284_v46, 5  ;;  %v291_v57 = vrot.slane %v289_v47, 4  ;;  %v294_v58 = vrot.slane %v292_v48, 5  ;;  %v43_v59 = vld [vmem:[%s3584_s0] sm:$0xf] }
   0xe   :  { %v273_v60 = vsel %vm2576_vm4, %v268_v50, %v272_v30  ;;  %v529_v61 = vunpack.c.l.b16 %v259_v55  ;;  %v281_v62 = vor.u32 %v280_v52, %v277_v51  ;;  %v300_v63 = vrot.slane %v298_v53, 5  ;;  %v44_v0 = vld [vmem:[%s3584_s0 + $0x4] sm:$0x1]  ;;  %v45_v1 = vld [vmem:[%s3584_s0 + $0x8] sm:$0xf] }
   0xf   :  { %v530_v3 = vunpack.c.l.b16 %v273_v60  ;;  %v295_v4 = vor.u32 %v294_v58, %v291_v57  ;;  %v2613_v5 = vor.u32 %v2292_v54, %v2172_v49  ;;  %v46_v6 = vld [vmem:[%s3584_s0 + $0xc] sm:$0x1]  ;;  %v79_v8 = vshrl.u32 %v43_v59, 16  ;;  %v2149_v13 = vld [vmem:[%s3585_s1 + $0x2] sm:$0x3] }
  0x10   :  { %v282_v9 = vrot.slane %v281_v62, 4  ;;  %v82_v10 = vshll.u32 %v43_v59, 16  ;;  %v88_v11 = vshll.u32 %v44_v0, 16  ;;  %v93_v12 = vshrl.u32 %v45_v1, 16  ;;  %v667_v17 = vld [vmem:[%s3586_s2] sm:$0x3] }
  0x11   :  { %v539_v14 = vpack.c.b16 %v530_v3, %v529_v61  ;;  %v81_v15 = vrot.slane %v79_v8, 4  ;;  %v96_v16 = vshll.u32 %v45_v1, 16  ;;  %v2180_v18 = vld [vmem:[%s3584_s0 + $0x70] sm:$0xf]  ;;  %v296_v19 = vrot.slane %v295_v4, 4 }
  0x12   :  { %355 = vrot.lane.b32.xlu2 %v2613_v5, %s2429_s15  ;;  %v84_v20 = vrot.slane %v82_v10, 5  ;;  %v90_v21 = vrot.slane %v88_v11, 5  ;;  %v95_v22 = vrot.slane %v93_v12, 4  ;;  %v2294_v23 = vld [vmem:[%s3584_s0 + $0x74] sm:$0xf0]  ;;  %v102_v26 = vshll.u32 %v46_v6, 16 }
  0x13   :  { %2205 = vmatmul.msk.bf16.vlgmr.msra.gmra.mxu3 %vm361_vm3, %v539_v14  ;;  %v98_v25 = vrot.slane %v96_v16, 5  ;;  %v388_v28 = vsel %vm386_vm0, %v2149_v13, 0  ;;  %v671_v29 = vsel %vm386_vm0, %v667_v17, 0  ;;  %v2637_v34 = vor.u32 %v2294_v23, %v2180_v18 }
  0x14   :  { %357 = vrot.lane.b32.xlu0 %v2582_v40, %s2429_s15  ;;  %v85_v27 = vor.u32 %v84_v20, %v81_v15  ;;  %v104_v32 = vrot.slane %v102_v26, 5  ;;  %397 = vmatpush.bf16.msra.mxu0 %v388_v28 }
  0x15   :  { %v99_v30 = vor.u32 %v98_v25, %v95_v22  ;;  %680 = vmatpush.bf16.msrb.mxu3 %v671_v29 }
  0x16   :  { %17 = vsyncpa [#allocation3], 0  ;;  %v86_v35 = vrot.slane %v85_v27, 4  ;;  %359 = vrot.lane.b32.xlu1 %v2637_v34, %s2429_s15  ;;  %v287_v37 = vsel %vm2576_vm4, %v282_v9, %v286_v56  ;;  %v301_v39 = vsel %vm2576_vm4, %v296_v19, %v300_v63  ;;  %v47_v49 = vld [vmem:[%s3584_s0 + $0x10] sm:$0xf]  ;;  %v761_v38 = vld [vmem:[%s3589_s5 + $0x20] sm:$0xff] }
  0x17   :  { %v100_v36 = vrot.slane %v99_v30, 4  ;;  %v531_v45 = vunpack.c.l.b16 %v287_v37  ;;  %v532_v46 = vunpack.c.l.b16 %v301_v39  ;;  %v49_v50 = vld [vmem:[%s3584_s0 + $0x18] sm:$0xf]  ;;  %v107_v51 = vshrl.u32 %v47_v49, 16  ;;  %v302_v55 = vld [vmem:[%s3585_s1] sm:$0x3] }
  0x18   :  { %v91_v41 = vsel %vm2576_vm4, %v86_v35, %v90_v21  ;;  %v110_v52 = vshll.u32 %v47_v49, 16  ;;  %v121_v53 = vshrl.u32 %v49_v50, 16  ;;  %v124_v54 = vshll.u32 %v49_v50, 16  ;;  %v48_v56 = vld [vmem:[%s3584_s0 + $0x14] sm:$0x1]  ;;  %s2435_s13 = smov 128  }
  0x19   :  { %v105_v42 = vsel %vm2576_vm4, %v100_v36, %v104_v32  ;;  %v517_v43 = vunpack.c.l.b16 %v91_v41  ;;  %v540_v48 = vpack.c.b16 %v532_v46, %v531_v45  ;;  %v50_v57 = vld [vmem:[%s3584_s0 + $0x1c] sm:$0x1]  ;;  %v464_v58 = vsel %vm386_vm0, %v302_v55, 0  ;;  %v51_v15 = vld [vmem:[%s3584_s0 + $0x20] sm:$0xf] }
  0x1a   :  { %v518_v44 = vunpack.c.l.b16 %v105_v42  ;;  %v109_v59 = vrot.slane %v107_v51, 4  ;;  %v112_v60 = vrot.slane %v110_v52, 5  ;;  %v116_v61 = vshll.u32 %v48_v56, 16  ;;  %473 = vmatpush.bf16.msrb.mxu0 %v464_v58  ;;  %2300 = vmatpush.bf16.msra.mxu1 %v464_v58  ;;  %v52_v20 = vld [vmem:[%s3584_s0 + $0x24] sm:$0x1] }
  0x1b   :  { %v123_v62 = vrot.slane %v121_v53, 4  ;;  %v126_v63 = vrot.slane %v124_v54, 5  ;;  %v130_v0 = vshll.u32 %v50_v57, 16  ;;  %v135_v16 = vshrl.u32 %v51_v15, 16  ;;  %v54_v21 = vld [vmem:[%s3584_s0 + $0x2c] sm:$0x1] }
  0x1c   :  { %v533_v47 = vpack.c.b16 %v518_v44, %v517_v43  ;;  %v113_v1 = vor.u32 %v112_v60, %v109_v59  ;;  %v118_v3 = vrot.slane %v116_v61, 5  ;;  %v138_v17 = vshll.u32 %v51_v15, 16  ;;  %v55_v45 = vld [vmem:[%s3584_s0 + $0x30] sm:$0xf]  ;;  %v757_v51 = vld [vmem:[%s3589_s5] sm:$0xff] }
  0x1d   :  { %v127_v4 = vor.u32 %v126_v63, %v123_v62  ;;  %v132_v6 = vrot.slane %v130_v0, 5  ;;  %2192 = vmatmul.msk.bf16.vlgmr.msra.gmra.mxu1 %vm361_vm3, %v2524_v7  ;;  %v53_v7 = vld [vmem:[%s3584_s0 + $0x28] sm:$0xf]  ;;  %v137_v22 = vrot.slane %v135_v16, 4  ;;  %v144_v25 = vshll.u32 %v52_v20, 16 }
  0x1e   :  { %2199 = vmatmul.msk.bf16.vlgmr.msra.gmra.mxu2 %vm361_vm3, %v533_v47  ;;  %v114_v8 = vrot.slane %v113_v1, 4  ;;  %v149_v18 = vshrl.u32 %v53_v7, 16  ;;  %v152_v19 = vshll.u32 %v53_v7, 16  ;;  %v140_v23 = vrot.slane %v138_v17, 5  ;;  %v56_v52 = vld [vmem:[%s3584_s0 + $0x34] sm:$0x1] }
  0x1f   :  { %v128_v9 = vrot.slane %v127_v4, 4  ;;  %v158_v28 = vshll.u32 %v54_v21, 16  ;;  %v146_v30 = vrot.slane %v144_v25, 5  ;;  %v163_v47 = vshrl.u32 %v55_v45, 16  ;;  %v58_v55 = vld [vmem:[%s3584_s0 + $0x3c] sm:$0x1] }
  0x20   :  { %v119_v10 = vsel %vm2576_vm4, %v114_v8, %v118_v3  ;;  %v151_v26 = vrot.slane %v149_v18, 4  ;;  %v154_v27 = vrot.slane %v152_v19, 5  ;;  %v141_v29 = vor.u32 %v140_v23, %v137_v22  ;;  %v758_v62 = vld [vmem:[%s3589_s5 + $0x8] sm:$0xff]  ;;  %v60_v19 = vld [vmem:[%s3584_s0 + $0x44] sm:$0x1]  ;;  %v760_v21 = vld [vmem:[%s3589_s5 + $0x18] sm:$0xff] }
  0x21   :  { %v133_v11 = vsel %vm2576_vm4, %v128_v9, %v132_v6  ;;  %v519_v12 = vunpack.c.l.b16 %v119_v10  ;;  %v160_v35 = vrot.slane %v158_v28, 5  ;;  %v2430_v53 = vmov 0   ;;  %v759_v9 = vld [vmem:[%s3589_s5 + $0x10] sm:$0xff]  ;;  %v61_v15 = vld [vmem:[%s3584_s0 + $0x48] sm:$0xf] }
  0x22   :  { %v520_v13 = vunpack.c.l.b16 %v133_v11  ;;  %v155_v32 = vor.u32 %v154_v27, %v151_v26  ;;  %v142_v36 = vrot.slane %v141_v29, 4  ;;  %2313 = vset.pattern.permute.xlu1 %v2430_v53  ;;  %v2431_v54 = vmov 1   ;;  %v62_v20 = vld [vmem:[%s3584_s0 + $0x4c] sm:$0x1] }
  0x23   :  { %2206 = vmatmul.msk.bf16.gmra.mxu3 %vm361_vm3, %v540_v48  ;;  %v166_v48 = vshll.u32 %v55_v45, 16  ;;  %2312 = vset.pattern.permute.xlu0 %v2431_v54  ;;  %v165_v56 = vrot.slane %v163_v47, 4  ;;  %v172_v58 = vshll.u32 %v56_v52, 16  ;;  %v186_v61 = vshll.u32 %v58_v55, 16  ;;  %v762_v27 = vld [vmem:[%s3589_s5 + $0x28] sm:$0xff] }
  0x24   :  { %v534_v14 = vpack.c.b16 %v520_v13, %v519_v12  ;;  %v156_v37 = vrot.slane %v155_v32, 4  ;;  %v147_v39 = vsel %vm2576_vm4, %v142_v36, %v146_v30  ;;  %775 = vperm.xlu1 %2313, %v757_v51   ;;  %2311 = vset.pattern.permute.xlu2 %v2431_v54  ;;  %v205_v17 = vshrl.u32 %v61_v15, 16  ;;  %v64_v52 = vld [vmem:[%s3584_s0 + $0x54] sm:$0x1]  ;;  %v66_v55 = vld [vmem:[%s3584_s0 + $0x5c] sm:$0x1] }
  0x25   :  { %v521_v42 = vunpack.c.l.b16 %v147_v39  ;;  %v168_v57 = vrot.slane %v166_v48, 5  ;;  %v174_v0 = vrot.slane %v172_v58, 5  ;;  %907 = vperm.xlu0 %2312, %v758_v62   ;;  %903 = vperm.xlu2 %2311, %v757_v51   ;;  %v188_v3 = vrot.slane %v186_v61, 5  ;;  %v763_v51 = vld [vmem:[%s3589_s5 + $0x30] sm:$0xff] }
  0x26   :  { %v161_v41 = vsel %vm2576_vm4, %v156_v37, %v160_v35  ;;  %v208_v18 = vshll.u32 %v61_v15, 16  ;;  %v200_v25 = vshll.u32 %v60_v19, 16  ;;  %v207_v26 = vrot.slane %v205_v17, 4  ;;  %v767_v15 = vld [vmem:[%s3589_s5 + $0x50] sm:$0xff] }
  0x27   :  { %v522_v43 = vunpack.c.l.b16 %v161_v41  ;;  %v169_v63 = vor.u32 %v168_v57, %v165_v56  ;;  %v214_v29 = vshll.u32 %v62_v20, 16  ;;  %v228_v58 = vshll.u32 %v64_v52, 16  ;;  %v771_v19 = vld [vmem:[%s3589_s5 + $0x70] sm:$0xff] }
  0x28   :  { %v210_v28 = vrot.slane %v208_v18, 5  ;;  %v202_v32 = vrot.slane %v200_v25, 5  ;;  %v242_v61 = vshll.u32 %v66_v55, 16  ;;  %v769_v18 = vld [vmem:[%s3589_s5 + $0x60] sm:$0xff]  ;;  %v738_v55 = vlaneseq }
  0x29   :  { %v535_v44 = vpack.c.b16 %v522_v43, %v521_v42  ;;  %v170_v4 = vrot.slane %v169_v63, 4  ;;  %v216_v36 = vrot.slane %v214_v29, 5  ;;  %v230_v63 = vrot.slane %v228_v58, 5 }
  0x2a   :  { %v211_v35 = vor.u32 %v210_v28, %v207_v26  ;;  %vm1009_vm7 = vcmask 130048  }
  0x2b   :  { %v175_v8 = vsel %vm2576_vm4, %v170_v4, %v174_v0 }
  0x2c   :  { %v523_v11 = vunpack.c.l.b16 %v175_v8  ;;  %2315 = vset.pattern.permute.xlu1 %v2431_v54  ;;  %v212_v39 = vrot.slane %v211_v35, 4 }
  0x2d   :  { %2193 = vmatmul.msk.bf16.gmra.mxu1 %vm361_vm3, %v2563_v33  ;;  %v57_v33 = vld [vmem:[%s3584_s0 + $0x38] sm:$0xf]  ;;  %911 = vperm.xlu1 %2315, %v759_v9  }
  0x2e   :  { %2200 = vmatmul.msk.bf16.gmra.mxu2 %vm361_vm3, %v534_v14  ;;  %v177_v49 = vshrl.u32 %v57_v33, 16  ;;  %v180_v50 = vshll.u32 %v57_v33, 16  ;;  %2317 = vset.pattern.permute.xlu0 %v2430_v53  ;;  %v59_v14 = vld [vmem:[%s3584_s0 + $0x40] sm:$0xf]  ;;  %v217_v42 = vsel %vm2576_vm4, %v212_v39, %v216_v36 }
  0x2f   :  { %785 = vperm.xlu0 %2317, %v759_v9   ;;  %2314 = vset.pattern.permute.xlu2 %v2430_v53  ;;  %v191_v7 = vshrl.u32 %v59_v14, 16  ;;  %v194_v16 = vshll.u32 %v59_v14, 16 }
  0x30   :  { %v179_v59 = vrot.slane %v177_v49, 4  ;;  %v182_v60 = vrot.slane %v180_v50, 5  ;;  %780 = vperm.xlu2 %2314, %v758_v62  }
  0x31   :  { %v193_v22 = vrot.slane %v191_v7, 4  ;;  %v196_v23 = vrot.slane %v194_v16, 5  ;;  %v770_v16 = vld [vmem:[%s3589_s5 + $0x68] sm:$0xff] }
  0x32   :  { %v183_v1 = vor.u32 %v182_v60, %v179_v59 }
  0x33   :  { %v197_v30 = vor.u32 %v196_v23, %v193_v22  ;;  %v772_v22 = vld [vmem:[%s3589_s5 + $0x78] sm:$0xff] }
  0x34   :  { %v184_v6 = vrot.slane %v183_v1, 4  ;;  %v244_v1 = vrot.slane %v242_v61, 5 }
  0x35   :  { %2318 = vset.pattern.permute.xlu1 %v2430_v53  ;;  %v198_v37 = vrot.slane %v197_v30, 4 }
  0x36   :  { %v189_v10 = vsel %vm2576_vm4, %v184_v6, %v188_v3  ;;  %790 = vperm.xlu1 %2318, %v760_v21  }
  0x37   :  { %v524_v12 = vunpack.c.l.b16 %v189_v10  ;;  %800 = vperm.xlu0 %2317, %v762_v27   ;;  %v203_v41 = vsel %vm2576_vm4, %v198_v37, %v202_v32 }
  0x38   :  { %2316 = vset.pattern.permute.xlu2 %v2431_v54  ;;  %v525_v43 = vunpack.c.l.b16 %v203_v41 }
  0x39   :  { %v536_v13 = vpack.c.b16 %v524_v12, %v523_v11  ;;  %915 = vperm.xlu2 %2316, %v760_v21   ;;  %v764_v12 = vld [vmem:[%s3589_s5 + $0x38] sm:$0xff] }
  0x3d   :  { %2194 = vmatmul.msk.bf16.gmra.mxu1 %vm361_vm3, %v2558_v31 }
  0x3e   :  { %2201 = vmatmul.msk.bf16.gmra.mxu2 %vm361_vm3, %v535_v44  ;;  %v526_v44 = vunpack.c.l.b16 %v217_v42  ;;  %2319 = vset.pattern.permute.xlu1 %v2431_v54 }
  0x3f   :  { %923 = vperm.xlu1 %2319, %v762_v27   ;;  %805 = vperm.xlu0 %2317, %v763_v51  }
  0x40   :  { %v537_v45 = vpack.c.b16 %v526_v44, %v525_v43 }
  0x41   :  { %919 = vperm.xlu2 %2316, %v761_v38  }
  0x47   :  { %927 = vperm.xlu1 %2319, %v763_v51   ;;  %2323 = vset.pattern.permute.xlu0 %v2431_v54 }
  0x49   :  { %2320 = vset.pattern.permute.xlu2 %v2430_v53 }
  0x4a   :  { %795 = vperm.xlu2 %2320, %v761_v38  }
  0x4d   :  { %2195 = vmatmul.msk.bf16.gmra.mxu1 %vm361_vm3, %v2613_v5  ;;  %v63_v5 = vld [vmem:[%s3584_s0 + $0x50] sm:$0xf] }
  0x4e   :  { %2202 = vmatmul.msk.bf16.gmra.mxu2 %vm361_vm3, %v536_v13  ;;  %v219_v47 = vshrl.u32 %v63_v5, 16  ;;  %v222_v48 = vshll.u32 %v63_v5, 16 }
  0x4f   :  { %2322 = vset.pattern.permute.xlu1 %v2430_v53 }
  0x50   :  { %v221_v56 = vrot.slane %v219_v47, 4  ;;  %v224_v57 = vrot.slane %v222_v48, 5  ;;  %810 = vperm.xlu1 %2322, %v764_v12  }
  0x52   :  { %v225_v62 = vor.u32 %v224_v57, %v221_v56  ;;  %2321 = vset.pattern.permute.xlu2 %v2431_v54  ;;  %v2295_v56 = vld [vmem:[%s3588_s4] sm:$0xff]  ;;  %v2296_v57 = vld [vmem:[%s3588_s4 + $0x8] sm:$0xff] }
  0x53   :  { %931 = vperm.xlu2 %2321, %v764_v12   ;;  %1120 = vmatpush.bf16.msrb.mxu1 %v2295_v56 }
  0x54   :  { %v226_v3 = vrot.slane %v225_v62, 4  ;;  %2302 = vmatpush.bf16.msra.mxu3 %v2296_v57 }
  0x56   :  { %v231_v6 = vsel %vm2576_vm4, %v226_v3, %v230_v63  ;;  %v2891_v3 = vshrl.u32 %v738_v55, 7 }
  0x57   :  { %v527_v9 = vunpack.c.l.b16 %v231_v6 }
  0x58   :  { %vm885_vm5 = vcmp.lt.s32.totalorder %v2891_v3, 7  ;;  %vm740_vm6 = vcmp.lt.s32.totalorder %v2891_v3, 1 }
  0x5d   :  { %2196 = vmatmul.msk.bf16.gmra.mxu1 %vm361_vm3, %v2582_v40  ;;  %v766_v40 = vld [vmem:[%s3589_s5 + $0x48] sm:$0xff] }
  0x5e   :  { %2203 = vmatmul.msk.bf16.gmra.mxu2 %vm361_vm3, %v537_v45  ;;  %939 = vperm.xlu0 %2323, %v766_v40  }
  0x64   :  { %v354_v14 = vpop.permute.xlu2 %353 }
  0x66   :  { %2327 = vset.pattern.permute.xlu0 %v2430_v53 }
  0x67   :  { %825 = vperm.xlu0 %2327, %v767_v15  }
  0x6c   :  { %v356_v7 = vpop.permute.xlu2 %355 }
  0x6d   :  { %2197 = vmatmul.msk.bf16.gmra.mxu1 %vm361_vm3, %v2637_v34  ;;  %v768_v34 = vld [vmem:[%s3589_s5 + $0x58] sm:$0xff] }
  0x6f   :  { %840 = vperm.xlu0 %2327, %v770_v16  }
  0x76   :  { %v346_v46 = vpop.permute.xlu0 %345 }
  0x77   :  { %2182 = vmatmul.msk.bf16.vlgmr.msra.gmra.mxu0 %vm361_vm3, %v346_v46  ;;  %2207 = vmatmul.msk.bf16.vlgmr.msrb.gmra.mxu3 %vm361_vm3, %v346_v46  ;;  %v350_v33 = vpop.permute.xlu1 %349  ;;  %v65_v46 = vld [vmem:[%s3584_s0 + $0x58] sm:$0xf] }
  0x78   :  { %v233_v49 = vshrl.u32 %v65_v46, 16  ;;  %v236_v50 = vshll.u32 %v65_v46, 16  ;;  %845 = vperm.xlu0 %2327, %v771_v19   ;;  %1041 = vmatpush.bf16.msra.mxu0 %v2296_v57 }
  0x7a   :  { %v235_v59 = vrot.slane %v233_v49, 4  ;;  %v238_v60 = vrot.slane %v236_v50, 5  ;;  %v2877_v50 = vld [vmem:[%s3587_s3] ss:$0 sm:$0xff] }
  0x7c   :  { %v239_v0 = vor.u32 %v238_v60, %v235_v59 }
  0x7e   :  { %v348_v31 = vpop.permute.xlu0 %347  ;;  %v240_v4 = vrot.slane %v239_v0, 4 }
  0x7f   :  { %v352_v13 = vpop.permute.xlu1 %351  ;;  %v2853_v29 = vpop.permute.xlu2 %903 }
  0x80   :  { %v245_v8 = vsel %vm2576_vm4, %v240_v4, %v244_v1  ;;  %2333 = vset.pattern.permute.xlu0 %v2431_v54 }
  0x81   :  { %v528_v10 = vunpack.c.l.b16 %v245_v8 }
  0x83   :  { %v538_v11 = vpack.c.b16 %v528_v10, %v527_v9 }
  0x85   :  { %2204 = vmatmul.msk.bf16.gmra.mxu2 %vm361_vm3, %v538_v11 }
  0x86   :  { %v358_v17 = vpop.permute.xlu0 %357 }
  0x87   :  { %2183 = vmatmul.msk.bf16.gmra.mxu0 %vm361_vm3, %v348_v31  ;;  %2208 = vmatmul.msk.bf16.gmra.mxu3 %vm361_vm3, %v348_v31  ;;  %v765_v31 = vld [vmem:[%s3589_s5 + $0x40] sm:$0xff] }
  0x88   :  { %815 = vperm.xlu1 %2322, %v765_v31   ;;  %935 = vperm.xlu2 %2321, %v765_v31   ;;  %v360_v21 = vpop.permute.xlu1 %359 }
  0x8a   :  { %v2861_v36 = vpop.permute.xlu2 %780 }
  0x90   :  { %2325 = vset.pattern.permute.xlu1 %v2431_v54  ;;  %2324 = vset.pattern.permute.xlu2 %v2430_v53 }
  0x91   :  { %943 = vperm.xlu1 %2325, %v767_v15   ;;  %820 = vperm.xlu2 %2324, %v766_v40  }
  0x93   :  { %v2867_v42 = vpop.permute.xlu2 %915 }
  0x97   :  { %2184 = vmatmul.msk.bf16.gmra.mxu0 %vm361_vm3, %v350_v33  ;;  %2209 = vmatmul.msk.bf16.gmra.mxu3 %vm361_vm3, %v350_v33  ;;  %v2297_v33 = vld [vmem:[%s3588_s4 + $0x10] sm:$0xff]  ;;  %v2887_v59 = vpop.permute.xlu0 %907  ;;  %s2137_s4 = sshll.u32 %s3596_s12, 4  ;;  %s2138_s4 = int_to_ptr.hbm [resolvable:$true] %s2137_s4 }
  0x98   :  { %1210 = vmatpush.bf16.msrb.mxu2 %v2297_v33 }
  0x99   :  { %2328 = vset.pattern.permute.xlu1 %v2430_v53  ;;  %2326 = vset.pattern.permute.xlu2 %v2431_v54 }
  0x9a   :  { %830 = vperm.xlu1 %2328, %v768_v34   ;;  %947 = vperm.xlu2 %2326, %v768_v34   ;;  %v485_v28 = vpop.f32.mrf.mxu1 }
  0x9b   :  { %v920_v49 = vpop.permute.xlu2 %919 }
  0xa1   :  { %v2830_v20 = vpop.f32.mrf.mxu2  ;;  %v2908_v15 = vpop.permute.xlu0 %785 }
  0xa2   :  { %2329 = vset.pattern.permute.xlu1 %v2431_v54  ;;  %951 = vperm.xlu2 %2326, %v769_v18   ;;  %v487_v35 = vpop.f32.mrf.mxu1 }
  0xa3   :  { %955 = vperm.xlu1 %2329, %v770_v16  }
  0xa4   :  { %v2895_v8 = vpop.permute.xlu2 %795 }
  0xa7   :  { %2185 = vmatmul.msk.bf16.gmra.mxu0 %vm361_vm3, %v352_v13  ;;  %2210 = vmatmul.msk.bf16.gmra.mxu3 %vm361_vm3, %v352_v13 }
  0xa9   :  { %v2840_v23 = vpop.f32.mrf.mxu2 }
  0xaa   :  { %2330 = vset.pattern.permute.xlu2 %v2430_v53  ;;  %v490_v39 = vpop.f32.mrf.mxu1 }
  0xab   :  { %959 = vperm.xlu1 %2329, %v771_v19   ;;  %835 = vperm.xlu2 %2330, %v769_v18  }
  0xb1   :  { %v2843_v25 = vpop.f32.mrf.mxu2 }
  0xb2   :  { %v492_v5 = vpop.f32.mrf.mxu1 }
  0xb3   :  { %2332 = vset.pattern.permute.xlu1 %v2430_v53  ;;  %2331 = vset.pattern.permute.xlu2 %v2431_v54  ;;  %v2859_v54 = vpop.permute.xlu1 %775 }
  0xb4   :  { %850 = vperm.xlu1 %2332, %v772_v22   ;;  %963 = vperm.xlu2 %2331, %v772_v22   ;;  %v932_v22 = vpop.permute.xlu2 %931 }
  0xb7   :  { %2186 = vmatmul.msk.bf16.gmra.mxu0 %vm361_vm3, %v354_v14  ;;  %2211 = vmatmul.msk.bf16.gmra.mxu3 %vm361_vm3, %v354_v14 }
  0xb9   :  { %v2849_v26 = vpop.f32.mrf.mxu2 }
  0xba   :  { %v495_v62 = vpop.f32.mrf.mxu1 }
  0xbb   :  { %v2865_v41 = vpop.permute.xlu1 %911 }
  0xc1   :  { %v587_v32 = vpop.f32.mrf.mxu2 }
  0xc2   :  { %v497_v34 = vpop.f32.mrf.mxu1 }
  0xc3   :  { %v2872_v46 = vpop.permute.xlu1 %790 }
  0xc7   :  { %2187 = vmatmul.msk.bf16.gmra.mxu0 %vm361_vm3, %v356_v7  ;;  %2212 = vmatmul.msk.bf16.gmra.mxu3 %vm361_vm3, %v356_v7 }
  0xcb   :  { %v924_v1 = vpop.permute.xlu1 %923 }
  0xd7   :  { %2188 = vmatmul.msk.bf16.gmra.mxu0 %vm361_vm3, %v358_v17  ;;  %2213 = vmatmul.msk.bf16.gmra.mxu3 %vm361_vm3, %v358_v17  ;;  %v928_v17 = vpop.permute.xlu1 %927 }
  0xe7   :  { %2189 = vmatmul.msk.bf16.gmra.mxu0 %vm361_vm3, %v360_v21  ;;  %2214 = vmatmul.msk.bf16.gmra.mxu3 %vm361_vm3, %v360_v21 }
  0xf4   :  { %v2845_v53 = vpop.f32.mrf.mxu0 }
  0xf7   :  { %2190 = vmatmul.msk.bf16.vlgmr.msrb.gmra.mxu0 %vm361_vm3, %v2508_v2  ;;  %v589_v2 = vpop.f32.mrf.mxu2 }
  0xfc   :  { %v2851_v27 = vpop.f32.mrf.mxu0 }
 0x104   :  { %v2855_v30 = vpop.f32.mrf.mxu0 }
 0x107   :  { %2191 = vmatmul.msk.bf16.gmra.mxu0 %vm361_vm3, %v2553_v24  ;;  %v592_v24 = vpop.f32.mrf.mxu2 }
 0x10c   :  { %v2863_v37 = vpop.f32.mrf.mxu0 }
 0x10f   :  { %v594_v60 = vpop.f32.mrf.mxu2 }
 0x114   :  { %v409_v43 = vpop.f32.mrf.mxu0 }
 0x115   :  { %v486_v44 = vadd.f32 %v485_v28, %v409_v43 }
 0x117   :  { %v621_v45 = vadd.f32 %v587_v32, %v486_v44  ;;  %v597_v14 = vpop.f32.mrf.mxu2  ;;  %v2921_v44 = vpop.permute.xlu0 %800 }
 0x119   :  { %v639_v58 = vadd.f32 %v2877_v50, %v621_v45  ;;  %v500_v45 = vpop.f32.mrf.mxu1 }
 0x11b   :  { %v2893_v4 = vmax.f32 %v639_v58, 0.0 }
 0x11c   :  { %v411_v47 = vpop.f32.mrf.mxu0 }
 0x11d   :  { %v488_v48 = vadd.f32 %v487_v35, %v411_v47  ;;  %v873_v12 = vrot.slane %v2893_v4, 1 }
 0x11f   :  { %v622_v51 = vadd.f32 %v589_v2, %v488_v48  ;;  %v599_v43 = vpop.f32.mrf.mxu2  ;;  %v936_v48 = vpop.permute.xlu2 %935 }
 0x121   :  { %v640_v52 = vadd.f32 %v2877_v50, %v622_v51 }
 0x123   :  { %v2889_v63 = vmax.f32 %v640_v52, 0.0 }
 0x124   :  { %v414_v61 = vpop.f32.mrf.mxu0 }
 0x125   :  { %v491_v0 = vadd.f32 %v490_v39, %v414_v61  ;;  %v874_v10 = vrot.slane %v2889_v63, 1 }
 0x127   :  { %v623_v6 = vadd.f32 %v592_v24, %v491_v0  ;;  %v896_v38 = vsel %vm885_vm5, %v873_v12, %v874_v10  ;;  %v602_v0 = vpop.f32.mrf.mxu2 }
 0x128   :  { %v2912_v18 = vmul.f32 %v920_v49, %v896_v38 }
 0x129   :  { %v641_v9 = vadd.f32 %v2877_v50, %v623_v6 }
 0x12b   :  { %v2900_v11 = vmax.f32 %v641_v9, 0.0 }
 0x12c   :  { %v416_v13 = vpop.f32.mrf.mxu0 }
 0x12d   :  { %v875_v40 = vrot.slane %v2900_v11, 1  ;;  %v493_v31 = vadd.f32 %v492_v5, %v416_v13  ;;  %v2925_v5 = vpop.permute.xlu1 %810 }
 0x12f   :  { %v895_v7 = vsel %vm885_vm5, %v874_v10, %v875_v40  ;;  %v624_v16 = vadd.f32 %v594_v60, %v493_v31  ;;  %v502_v10 = vpop.f32.mrf.mxu1 }
 0x130   :  { %v2914_v19 = vmul.f32 %v924_v1, %v895_v7  ;;  %v2936_v1 = vpop.permute.xlu0 %805 }
 0x131   :  { %v642_v21 = vadd.f32 %v2877_v50, %v624_v16  ;;  %v821_v16 = vpop.permute.xlu2 %820 }
 0x133   :  { %v2919_v35 = vmax.f32 %v642_v21, 0.0 }
 0x134   :  { %v419_v32 = vpop.f32.mrf.mxu0 }
 0x135   :  { %v496_v2 = vadd.f32 %v495_v62, %v419_v32  ;;  %v876_v33 = vrot.slane %v2919_v35, 1  ;;  %v3597_v9 = vrot.slane %v2919_v35, 7  ;;  %v816_v38 = vpop.permute.xlu1 %815 }
 0x137   :  { %v625_v39 = vadd.f32 %v597_v14, %v496_v2  ;;  %v894_v51 = vsel %vm885_vm5, %v875_v40, %v876_v33 }
 0x138   :  { %v2931_v58 = vmul.f32 %v928_v17, %v894_v51 }
 0x139   :  { %v643_v24 = vadd.f32 %v2877_v50, %v625_v39 }
 0x13b   :  { %v659_v47 = vmax.f32 %v643_v24, 0.0 }
 0x13c   :  { %v421_v49 = vpop.f32.mrf.mxu0 }
 0x13d   :  { %v877_v52 = vrot.slane %v659_v47, 1  ;;  %v498_v55 = vadd.f32 %v497_v34, %v421_v49  ;;  %v730_v61 = vrot.slane %v659_v47, 7  ;;  %v944_v49 = vpop.permute.xlu1 %943 }
 0x13f   :  { %v893_v56 = vsel %vm885_vm5, %v876_v33, %v877_v52  ;;  %v626_v57 = vadd.f32 %v599_v43, %v498_v55  ;;  %v748_v40 = vsel %vm740_vm6, %v3597_v9, %v730_v61  ;;  %v940_v33 = vpop.permute.xlu0 %939 }
 0x140   :  { %v2933_v60 = vmul.f32 %v932_v22, %v893_v56  ;;  %v2951_v2 = vmul.f32 %v816_v38, %v748_v40 }
 0x141   :  { %v644_v62 = vadd.f32 %v2877_v50, %v626_v57 }
 0x143   :  { %v660_v13 = vmax.f32 %v644_v62, 0.0 }
 0x144   :  { %v424_v31 = vpop.f32.mrf.mxu0 }
 0x145   :  { %v996_v14 = vpack.c.bf16 %v660_v13, %v659_v47  ;;  %v878_v34 = vrot.slane %v660_v13, 1  ;;  %v501_v7 = vadd.f32 %v500_v45, %v424_v31  ;;  %v731_v17 = vrot.slane %v660_v13, 7  ;;  %v604_v47 = vpop.f32.mrf.mxu2  ;;  %v607_v13 = vpop.f32.mrf.mxu3 }
 0x147   :  { %v892_v21 = vsel %vm885_vm5, %v877_v52, %v878_v34  ;;  %v627_v22 = vadd.f32 %v602_v0, %v501_v7  ;;  %v747_v32 = vsel %vm740_vm6, %v730_v61, %v731_v17  ;;  %2225 = vmatmul.msk.bf16.vlgmr.msra.gmra.mxu3 %vm1009_vm7, %v996_v14  ;;  %v505_v52 = vpop.f32.mrf.mxu1  ;;  %v948_v14 = vpop.permute.xlu2 %947 }
 0x148   :  { %v2953_v39 = vmul.f32 %v821_v16, %v747_v32  ;;  %v2962_v38 = vmul.f32 %v936_v48, %v892_v21  ;;  %v826_v32 = vpop.permute.xlu0 %825 }
 0x149   :  { %v645_v43 = vadd.f32 %v2877_v50, %v627_v22 }
 0x14b   :  { %v661_v24 = vmax.f32 %v645_v43, 0.0  ;;  %v831_v43 = vpop.permute.xlu1 %830 }
 0x14c   :  { %v426_v51 = vpop.f32.mrf.mxu0 }
 0x14d   :  { %v879_v55 = vrot.slane %v661_v24, 1  ;;  %v503_v56 = vadd.f32 %v502_v10, %v426_v51  ;;  %v732_v57 = vrot.slane %v661_v24, 7 }
 0x14f   :  { %v891_v61 = vsel %vm885_vm5, %v878_v34, %v879_v55  ;;  %v628_v62 = vadd.f32 %v604_v47, %v503_v56  ;;  %v746_v0 = vsel %vm740_vm6, %v731_v17, %v732_v57  ;;  %v507_v17 = vpop.f32.mrf.mxu1 }
 0x150   :  { %v2964_v40 = vmul.f32 %v940_v33, %v891_v61  ;;  %v2974_v56 = vmul.f32 %v826_v32, %v746_v0  ;;  %v841_v6 = vpop.permute.xlu0 %840 }
 0x151   :  { %v646_v31 = vadd.f32 %v2877_v50, %v628_v62 }
 0x153   :  { %v662_v10 = vmax.f32 %v646_v31, 0.0 }
 0x154   :  { %v429_v16 = vpop.f32.mrf.mxu0 }
 0x155   :  { %v880_v22 = vrot.slane %v662_v10, 1  ;;  %v506_v34 = vadd.f32 %v505_v52, %v429_v16  ;;  %v733_v47 = vrot.slane %v662_v10, 7  ;;  %v997_v51 = vpack.c.bf16 %v662_v10, %v661_v24  ;;  %v609_v52 = vpop.f32.mrf.mxu3  ;;  %v952_v10 = vpop.permute.xlu2 %951 }
 0x157   :  { %v890_v48 = vsel %vm885_vm5, %v879_v55, %v880_v22  ;;  %v629_v21 = vadd.f32 %v607_v13, %v506_v34  ;;  %v745_v33 = vsel %vm740_vm6, %v732_v57, %v733_v47  ;;  %2226 = vmatmul.msk.bf16.gmra.mxu3 %vm1009_vm7, %v997_v51 }
 0x158   :  { %v2976_v61 = vmul.f32 %v831_v43, %v745_v33  ;;  %v2985_v32 = vmul.f32 %v944_v49, %v890_v48  ;;  %v510_v43 = vpop.f32.mrf.mxu1  ;;  %v956_v33 = vpop.permute.xlu1 %955 }
 0x159   :  { %v647_v62 = vadd.f32 %v2877_v50, %v629_v21 }
 0x15b   :  { %v663_v31 = vmax.f32 %v647_v62, 0.0 }
 0x15c   :  { %v431_v16 = vpop.f32.mrf.mxu0 }
 0x15d   :  { %v881_v55 = vrot.slane %v663_v31, 1  ;;  %v508_v13 = vadd.f32 %v507_v17, %v431_v16  ;;  %v734_v34 = vrot.slane %v663_v31, 7  ;;  %v612_v16 = vpop.f32.mrf.mxu3 }
 0x15f   :  { %v630_v7 = vadd.f32 %v609_v52, %v508_v13  ;;  %v744_v57 = vsel %vm740_vm6, %v733_v47, %v734_v34  ;;  %v889_v0 = vsel %vm885_vm5, %v880_v22, %v881_v55  ;;  %v836_v13 = vpop.permute.xlu2 %835 }
 0x160   :  { %v2987_v51 = vmul.f32 %v948_v14, %v889_v0  ;;  %v2997_v48 = vmul.f32 %v836_v13, %v744_v57 }
 0x161   :  { %v648_v21 = vadd.f32 %v2877_v50, %v630_v7 }
 0x163   :  { %v664_v17 = vmax.f32 %v648_v21, 0.0 }
 0x164   :  { %v434_v52 = vpop.f32.mrf.mxu0 }
 0x165   :  { %v511_v24 = vadd.f32 %v510_v43, %v434_v52  ;;  %v882_v47 = vrot.slane %v664_v17, 1  ;;  %v735_v45 = vrot.slane %v664_v17, 7  ;;  %v998_v22 = vpack.c.bf16 %v664_v17, %v663_v31  ;;  %v512_v52 = vpop.f32.mrf.mxu1  ;;  %v614_v28 = vpop.f32.mrf.mxu3 }
 0x166   :  { %v846_v43 = vpop.permute.xlu0 %845 }
 0x167   :  { %v631_v49 = vadd.f32 %v612_v16, %v511_v24  ;;  %v888_v14 = vsel %vm885_vm5, %v881_v55, %v882_v47  ;;  %v743_v7 = vsel %vm740_vm6, %v734_v34, %v735_v45  ;;  %2227 = vmatmul.msk.bf16.gmra.mxu3 %vm1009_vm7, %v998_v22  ;;  %v960_v24 = vpop.permute.xlu1 %959 }
 0x168   :  { %v2999_v0 = vmul.f32 %v841_v6, %v743_v7  ;;  %v3008_v13 = vmul.f32 %v952_v10, %v888_v14 }
 0x169   :  { %v649_v21 = vadd.f32 %v2877_v50, %v631_v49 }
 0x16b   :  { %v665_v31 = vmax.f32 %v649_v21, 0.0 }
 0x16c   :  { %v436_v17 = vpop.f32.mrf.mxu0 }
 0x16d   :  { %v883_v16 = vrot.slane %v665_v31, 1  ;;  %v513_v55 = vadd.f32 %v512_v52, %v436_v17  ;;  %v736_v62 = vrot.slane %v665_v31, 7 }
 0x16f   :  { %v887_v34 = vsel %vm885_vm5, %v882_v47, %v883_v16  ;;  %v632_v57 = vadd.f32 %v614_v28, %v513_v55  ;;  %v742_v6 = vsel %vm740_vm6, %v735_v45, %v736_v62  ;;  %v851_v47 = vpop.permute.xlu1 %850 }
 0x170   :  { %v3010_v22 = vmul.f32 %v956_v33, %v887_v34  ;;  %v3022_v14 = vmul.f32 %v846_v43, %v742_v6 }
 0x171   :  { %v650_v49 = vadd.f32 %v2877_v50, %v632_v57 }
 0x172   :  { %v1168_v7 = vpack.c.bf16 %v3010_v22, %v3008_v13 }
 0x173   :  { %v666_v21 = vmax.f32 %v650_v49, 0.0 }
 0x174   :  { %v475_v52 = vpop.f32.mrf.mxu0 }
 0x175   :  { %v884_v17 = vrot.slane %v666_v21, 1  ;;  %v476_v9 = vadd.f32 %v475_v52, %v2845_v53  ;;  %v737_v28 = vrot.slane %v666_v21, 7  ;;  %v999_v55 = vpack.c.bf16 %v666_v21, %v665_v31  ;;  %v964_v21 = vpop.permute.xlu2 %963 }
 0x177   :  { %v886_v45 = vsel %vm885_vm5, %v883_v16, %v884_v17  ;;  %v617_v10 = vadd.f32 %v2830_v20, %v476_v9  ;;  %v741_v33 = vsel %vm740_vm6, %v736_v62, %v737_v28  ;;  %2228 = vmatmul.msk.bf16.gmra.mxu3 %vm1009_vm7, %v999_v55 }
 0x178   :  { %v3024_v34 = vmul.f32 %v851_v47, %v741_v33  ;;  %v3033_v43 = vmul.f32 %v960_v24, %v886_v45 }
 0x179   :  { %v635_v57 = vadd.f32 %v2877_v50, %v617_v10 }
 0x17a   :  { %v989_v53 = vpack.c.bf16 %v3024_v34, %v3022_v14  ;;  %v3167_v34 = vld [vmem:[%s3587_s3 + $0x1] ss:$0 sm:$0xff] }
 0x17b   :  { %v651_v31 = vmax.f32 %v635_v57, 0.0 }
 0x17c   :  { %v477_v49 = vpop.f32.mrf.mxu0 }
 0x17d   :  { %v478_v16 = vadd.f32 %v477_v49, %v2851_v27  ;;  %v869_v20 = vrot.slane %v651_v31, 1  ;;  %v722_v52 = vrot.slane %v651_v31, 7 }
 0x17f   :  { %v618_v9 = vadd.f32 %v2840_v23, %v478_v16  ;;  %v901_v62 = vsel %vm885_vm5, %v884_v17, %v869_v20  ;;  %v756_v23 = vsel %vm740_vm6, %v737_v28, %v722_v52 }
 0x180   :  { %v3035_v6 = vmul.f32 %v964_v21, %v901_v62  ;;  %v853_v45 = vmul.f32 %v2859_v54, %v756_v23 }
 0x181   :  { %v636_v47 = vadd.f32 %v2877_v50, %v618_v9 }
 0x182   :  { %v1169_v55 = vpack.c.bf16 %v3035_v6, %v3033_v43  ;;  %v3172_v43 = vld [vmem:[%s3587_s3 + $0x2] ss:$0 sm:$0xff] }
 0x183   :  { %v652_v10 = vmax.f32 %v636_v47, 0.0 }
 0x184   :  { %v480_v33 = vpop.f32.mrf.mxu0 }
 0x185   :  { %v723_v27 = vrot.slane %v652_v10, 7  ;;  %v992_v57 = vpack.c.bf16 %v652_v10, %v651_v31  ;;  %v481_v49 = vadd.f32 %v480_v33, %v2855_v30  ;;  %v870_v21 = vrot.slane %v652_v10, 1 }
 0x187   :  { %v619_v24 = vadd.f32 %v2843_v25, %v481_v49  ;;  %2221 = vmatmul.msk.bf16.vlgmr.msra.gmra.mxu0 %vm1009_vm7, %v992_v57  ;;  %v755_v17 = vsel %vm740_vm6, %v722_v52, %v723_v27  ;;  %v900_v47 = vsel %vm885_vm5, %v869_v20, %v870_v21 }
 0x188   :  { %v854_v16 = vmul.f32 %v2861_v36, %v755_v17  ;;  %v966_v36 = vmul.f32 %v2853_v29, %v900_v47 }
 0x189   :  { %v637_v9 = vadd.f32 %v2877_v50, %v619_v24 }
 0x18a   :  { %v982_v31 = vpack.c.bf16 %v854_v16, %v853_v45 }
 0x18b   :  { %v653_v62 = vmax.f32 %v637_v9, 0.0  ;;  %v726_v9 = vrot.slane %v2893_v4, 7 }
 0x18c   :  { %v482_v30 = vpop.f32.mrf.mxu0  ;;  %2233 = vmatmul.msk.bf16.vlgmr.msrb.gmra.mxu1 %vm1009_vm7, %v982_v31 }
 0x18d   :  { %v871_v28 = vrot.slane %v653_v62, 1  ;;  %v483_v25 = vadd.f32 %v482_v30, %v2863_v37  ;;  %v724_v33 = vrot.slane %v653_v62, 7  ;;  %v682_v30 = vpop.f32.mrf.mxu3 }
 0x18f   :  { %v620_v52 = vadd.f32 %v2849_v26, %v483_v25  ;;  %v899_v54 = vsel %vm885_vm5, %v870_v21, %v871_v28  ;;  %v754_v20 = vsel %vm740_vm6, %v723_v27, %v724_v33  ;;  %v728_v25 = vrot.slane %v2900_v11, 7 }
 0x190   :  { %v967_v10 = vmul.f32 %v2887_v59, %v899_v54  ;;  %v855_v59 = vmul.f32 %v2908_v15, %v754_v20  ;;  %v727_v15 = vrot.slane %v2889_v63, 7 }
 0x191   :  { %v638_v57 = vadd.f32 %v2877_v50, %v620_v52  ;;  %v3600_v52 = vrot.slane %v2919_v35, 7 }
 0x192   :  { %v1162_v49 = vpack.c.bf16 %v967_v10, %v966_v36 }
 0x193   :  { %v654_v23 = vmax.f32 %v638_v57, 0.0  ;;  %v749_v54 = vsel %vm740_vm6, %v728_v25, %v3600_v52  ;;  %v683_v57 = vadd.f32 %v3172_v43, %v682_v30 }
 0x194   :  { %2247 = vmatmul.msk.bf16.vlgmr.msrb.gmra.mxu2 %vm1009_vm7, %v1162_v49 }
 0x195   :  { %v725_v37 = vrot.slane %v654_v23, 7  ;;  %v993_v24 = vpack.c.bf16 %v654_v23, %v653_v62  ;;  %v872_v26 = vrot.slane %v654_v23, 1  ;;  %v994_v62 = vpack.c.bf16 %v2889_v63, %v2893_v4  ;;  %v684_v47 = vpop.f32.mrf.mxu3 }
 0x196   :  { %v3601_v63 = vpack.c.bf16 %v2914_v19, %v2912_v18  ;;  %v750_v4 = vsel %vm740_vm6, %v727_v15, %v728_v25  ;;  %v3602_v18 = vpack.c.bf16 %v2933_v60, %v2931_v58  ;;  %v2298_v19 = vld [vmem:[%s3592_s8] sm:$0xff]  ;;  %v3605_v60 = vpack.c.bf16 %v2976_v61, %v2974_v56  ;;  %s2436_s8 = smov 8  }
 0x197   :  { %2222 = vmatmul.msk.bf16.gmra.mxu0 %vm1009_vm7, %v993_v24  ;;  %v753_v29 = vsel %vm740_vm6, %v724_v33, %v725_v37  ;;  %v897_v45 = vsel %vm885_vm5, %v872_v26, %v873_v12  ;;  %v898_v16 = vsel %vm885_vm5, %v871_v28, %v872_v26  ;;  %v752_v31 = vsel %vm740_vm6, %v725_v37, %v726_v9 }
 0x198   :  { %v856_v17 = vmul.f32 %v2872_v46, %v753_v29  ;;  %v968_v27 = vmul.f32 %v2865_v41, %v898_v16  ;;  %v969_v21 = vmul.f32 %v2867_v42, %v897_v45  ;;  %v751_v12 = vsel %vm740_vm6, %v726_v9, %v727_v15  ;;  %1401 = vmatpush.bf16.msrb.mxu3 %v2298_v19  ;;  %v1318_v45 = vld [vmem:[%s3590_s6] sm:$0xff] }
 0x199   :  { %v857_v41 = vmul.f32 %v2895_v8, %v752_v31  ;;  %v858_v42 = vmul.f32 %v2921_v44, %v751_v12  ;;  %v995_v8 = vpack.c.bf16 %v2919_v35, %v2900_v11  ;;  %v860_v44 = vmul.f32 %v2925_v5, %v749_v54 }
 0x19a   :  { %v983_v50 = vpack.c.bf16 %v856_v17, %v855_v59  ;;  %v1163_v46 = vpack.c.bf16 %v969_v21, %v968_v27  ;;  %v859_v36 = vmul.f32 %v2936_v1, %v750_v4  ;;  %v3603_v11 = vpack.c.bf16 %v2953_v39, %v2951_v2  ;;  %v1319_v27 = vld [vmem:[%s3590_s6 + $0x8] sm:$0xff] }
 0x19b   :  { %v984_v28 = vpack.c.bf16 %v858_v42, %v857_v41  ;;  %v3604_v5 = vpack.c.bf16 %v2964_v40, %v2962_v38  ;;  %v3606_v1 = vpack.c.bf16 %v2987_v51, %v2985_v32  ;;  %v3607_v39 = vpack.c.bf16 %v2999_v0, %v2997_v48 }
 0x19c   :  { %2234 = vmatmul.msk.bf16.gmra.mxu1 %vm1009_vm7, %v983_v50  ;;  %v985_v10 = vpack.c.bf16 %v860_v44, %v859_v36  ;;  %v685_v29 = vadd.f32 %v3172_v43, %v684_v47 }
 0x19d   :  { %v687_v33 = vpop.f32.mrf.mxu3 }
 0x1a4   :  { %2248 = vmatmul.msk.bf16.gmra.mxu2 %vm1009_vm7, %v1163_v46 }
 0x1a5   :  { %v3111_v3 = vpop.f32.mrf.mxu3 }
 0x1a7   :  { %2223 = vmatmul.msk.bf16.gmra.mxu0 %vm1009_vm7, %v994_v62 }
 0x1ac   :  { %2235 = vmatmul.msk.bf16.gmra.mxu1 %vm1009_vm7, %v984_v28  ;;  %v688_v28 = vadd.f32 %v3172_v43, %v687_v33  ;;  %v1321_v33 = vld [vmem:[%s3590_s6 + $0x18] sm:$0xff] }
 0x1ad   :  { %v3120_v35 = vpop.f32.mrf.mxu3 }
 0x1b4   :  { %2249 = vmatmul.msk.bf16.gmra.mxu2 %vm1009_vm7, %v3601_v63 }
 0x1b5   :  { %v3126_v58 = vpop.f32.mrf.mxu3 }
 0x1b7   :  { %2224 = vmatmul.msk.bf16.gmra.mxu0 %vm1009_vm7, %v995_v8  ;;  %v690_v8 = vadd.f32 %v3172_v43, %v3111_v3 }
 0x1bc   :  { %2236 = vmatmul.msk.bf16.gmra.mxu1 %vm1009_vm7, %v985_v10 }
 0x1bd   :  { %v3136_v2 = vpop.f32.mrf.mxu3 }
 0x1c4   :  { %2250 = vmatmul.msk.bf16.gmra.mxu2 %vm1009_vm7, %v3602_v18 }
 0x1c5   :  { %v3142_v38 = vpop.f32.mrf.mxu3 }
 0x1cc   :  { %2237 = vmatmul.msk.bf16.gmra.mxu1 %vm1009_vm7, %v3603_v11  ;;  %v1320_v11 = vld [vmem:[%s3590_s6 + $0x10] sm:$0xff] }
 0x1cd   :  { %v3148_v40 = vpop.f32.mrf.mxu3 }
 0x1d4   :  { %2251 = vmatmul.msk.bf16.gmra.mxu2 %vm1009_vm7, %v3604_v5 }
 0x1d5   :  { %v3154_v56 = vpop.f32.mrf.mxu3 }
 0x1dc   :  { %2238 = vmatmul.msk.bf16.gmra.mxu1 %vm1009_vm7, %v3605_v60 }
 0x1dd   :  { %v3160_v51 = vpop.f32.mrf.mxu3 }
 0x1e4   :  { %2252 = vmatmul.msk.bf16.gmra.mxu2 %vm1009_vm7, %v3606_v1 }
 0x1e5   :  { %v3162_v22 = vpop.f32.mrf.mxu3 }
 0x1ec   :  { %2239 = vmatmul.msk.bf16.gmra.mxu1 %vm1009_vm7, %v3607_v39 }
 0x1ed   :  { %v3176_v20 = vpop.f32.mrf.mxu3 }
 0x1f4   :  { %2253 = vmatmul.msk.bf16.gmra.mxu2 %vm1009_vm7, %v1168_v7 }
 0x1f5   :  { %v3186_v42 = vpop.f32.mrf.mxu3 }
 0x1fc   :  { %2240 = vmatmul.msk.bf16.gmra.mxu1 %vm1009_vm7, %v989_v53 }
 0x1fd   :  { %v3194_v18 = vpop.f32.mrf.mxu3 }
 0x204   :  { %2254 = vmatmul.msk.bf16.gmra.mxu2 %vm1009_vm7, %v1169_v55  ;;  %v1043_v61 = vpop.f32.mrf.mxu0 }
 0x209   :  { %v1122_v32 = vpop.f32.mrf.mxu1 }
 0x20a   :  { %v1123_v13 = vadd.f32 %v1122_v32, %v1043_v61 }
 0x20c   :  { %v1045_v48 = vpop.f32.mrf.mxu0 }
 0x211   :  { %v1124_v0 = vpop.f32.mrf.mxu1 }
 0x212   :  { %v1125_v49 = vadd.f32 %v1124_v0, %v1045_v48 }
 0x214   :  { %v1048_v6 = vpop.f32.mrf.mxu0 }
 0x217   :  { %v1212_v7 = vpop.f32.mrf.mxu2 }
 0x218   :  { %v1252_v14 = vadd.f32 %v1212_v7, %v1123_v13  ;;  %v693_v13 = vadd.f32 %v3172_v43, %v3120_v35  ;;  %v1323_v35 = vld [vmem:[%s3590_s6 + $0x28] sm:$0xff] }
 0x219   :  { %v1127_v53 = vpop.f32.mrf.mxu1 }
 0x21a   :  { %v1270_v55 = vadd.f32 %v3167_v34, %v1252_v14  ;;  %v1128_v21 = vadd.f32 %v1127_v53, %v1048_v6  ;;  %v3206_v14 = vpop.f32.mrf.mxu3 }
 0x21c   :  { %v1286_v37 = vadd.f32 %v1270_v55, %v683_v57  ;;  %v1050_v16 = vpop.f32.mrf.mxu0 }
 0x21e   :  { %v1302_v17 = vmax.f32 %v1286_v37, 0.0 }
 0x21f   :  { %v1214_v23 = vpop.f32.mrf.mxu2 }
 0x220   :  { %v1253_v24 = vadd.f32 %v1214_v23, %v1125_v49  ;;  %v1334_v46 = vadd.f32 %v1318_v45, %v1302_v17  ;;  %v695_v49 = vadd.f32 %v3172_v43, %v3126_v58 }
 0x221   :  { %v1129_v26 = vpop.f32.mrf.mxu1 }
 0x222   :  { %v1271_v59 = vadd.f32 %v3167_v34, %v1253_v24  ;;  %v1130_v25 = vadd.f32 %v1129_v26, %v1050_v16 }
 0x224   :  { %v1287_v50 = vadd.f32 %v1271_v59, %v685_v29  ;;  %v1053_v47 = vpop.f32.mrf.mxu0  ;;  %v1322_v29 = vld [vmem:[%s3590_s6 + $0x20] sm:$0xff] }
 0x226   :  { %v1303_v9 = vmax.f32 %v1287_v50, 0.0  ;;  %v1063_v50 = vpop.f32.mrf.mxu3 }
 0x227   :  { %v1217_v15 = vpop.f32.mrf.mxu2 }
 0x228   :  { %v1335_v31 = vadd.f32 %v1319_v27, %v1303_v9  ;;  %v1254_v12 = vadd.f32 %v1217_v15, %v1128_v21 }
 0x229   :  { %v1132_v62 = vpop.f32.mrf.mxu1 }
 0x22a   :  { %v1350_v41 = vpack.c.bf16 %v1335_v31, %v1334_v46  ;;  %v1272_v30 = vadd.f32 %v3167_v34, %v1254_v12  ;;  %v1133_v19 = vadd.f32 %v1132_v62, %v1053_v47  ;;  %v698_v31 = vadd.f32 %v3172_v43, %v3136_v2  ;;  %v1325_v2 = vld [vmem:[%s3590_s6 + $0x38] sm:$0xff] }
 0x22b   :  { %v700_v47 = vadd.f32 %v3172_v43, %v3142_v38 }
 0x22c   :  { %2259 = vmatmul.msk.bf16.vlgmr.msrb.gmra.mxu3 %vm1009_vm7, %v1350_v41  ;;  %v1288_v54 = vadd.f32 %v1272_v30, %v688_v28  ;;  %v1055_v61 = vpop.f32.mrf.mxu0 }
 0x22e   :  { %v1304_v36 = vmax.f32 %v1288_v54, 0.0  ;;  %v1065_v28 = vpop.f32.mrf.mxu3 }
 0x22f   :  { %v1219_v52 = vpop.f32.mrf.mxu2 }
 0x230   :  { %v1255_v63 = vadd.f32 %v1219_v52, %v1130_v25  ;;  %v1336_v1 = vadd.f32 %v1320_v11, %v1304_v36 }
 0x231   :  { %v1134_v4 = vpop.f32.mrf.mxu1 }
 0x232   :  { %v1273_v44 = vadd.f32 %v3167_v34, %v1255_v63  ;;  %v1135_v7 = vadd.f32 %v1134_v4, %v1055_v61  ;;  %v1324_v4 = vld [vmem:[%s3590_s6 + $0x30] sm:$0xff] }
 0x234   :  { %v1289_v10 = vadd.f32 %v1273_v44, %v690_v8  ;;  %v1058_v37 = vpop.f32.mrf.mxu0 }
 0x236   :  { %v1305_v5 = vmax.f32 %v1289_v10, 0.0 }
 0x237   :  { %v1222_v60 = vpop.f32.mrf.mxu2 }
 0x238   :  { %v1337_v39 = vadd.f32 %v1321_v33, %v1305_v5  ;;  %v1256_v3 = vadd.f32 %v1222_v60, %v1133_v19  ;;  %v1068_v5 = vpop.f32.mrf.mxu3 }
 0x239   :  { %v1137_v32 = vpop.f32.mrf.mxu1 }
 0x23a   :  { %v1351_v48 = vpack.c.bf16 %v1337_v39, %v1336_v1  ;;  %v1274_v0 = vadd.f32 %v3167_v34, %v1256_v3  ;;  %v1138_v59 = vadd.f32 %v1137_v32, %v1058_v37  ;;  %v703_v1 = vadd.f32 %v3172_v43, %v3148_v40  ;;  %v1327_v40 = vld [vmem:[%s3590_s6 + $0x48] sm:$0xff] }
 0x23c   :  { %2260 = vmatmul.msk.bf16.gmra.mxu3 %vm1009_vm7, %v1351_v48  ;;  %v1290_v6 = vadd.f32 %v1274_v0, %v693_v13  ;;  %v1060_v46 = vpop.f32.mrf.mxu0  ;;  %v705_v48 = vadd.f32 %v3172_v43, %v3154_v56 }
 0x23e   :  { %v1306_v24 = vmax.f32 %v1290_v6, 0.0 }
 0x23f   :  { %v1224_v53 = vpop.f32.mrf.mxu2 }
 0x240   :  { %v1257_v55 = vadd.f32 %v1224_v53, %v1135_v7  ;;  %v1338_v16 = vadd.f32 %v1322_v29, %v1306_v24  ;;  %v1070_v6 = vpop.f32.mrf.mxu3 }
 0x241   :  { %v1139_v57 = vpop.f32.mrf.mxu1 }
 0x242   :  { %v1275_v23 = vadd.f32 %v3167_v34, %v1257_v55  ;;  %v1140_v12 = vadd.f32 %v1139_v57, %v1060_v46  ;;  %v1326_v55 = vld [vmem:[%s3590_s6 + $0x40] sm:$0xff]  ;;  %v1328_v46 = vld [vmem:[%s3590_s6 + $0x50] sm:$0xff] }
 0x244   :  { %v1291_v26 = vadd.f32 %v1275_v23, %v695_v49 }
 0x246   :  { %v1307_v17 = vmax.f32 %v1291_v26, 0.0 }
 0x247   :  { %v1227_v45 = vpop.f32.mrf.mxu2 }
 0x248   :  { %v1339_v27 = vadd.f32 %v1323_v35, %v1307_v17  ;;  %v1258_v58 = vadd.f32 %v1227_v45, %v1138_v59  ;;  %v708_v59 = vadd.f32 %v3172_v43, %v3160_v51  ;;  %v1329_v51 = vld [vmem:[%s3590_s6 + $0x58] sm:$0xff] }
 0x249   :  { %v1142_v21 = vpop.f32.mrf.mxu1 }
 0x24a   :  { %v1352_v9 = vpack.c.bf16 %v1339_v27, %v1338_v16  ;;  %v1276_v15 = vadd.f32 %v3167_v34, %v1258_v58  ;;  %v1143_v8 = vadd.f32 %v1142_v21, %v1063_v50  ;;  %v1073_v50 = vpop.f32.mrf.mxu3  ;;  %v710_v58 = vadd.f32 %v3172_v43, %v3162_v22 }
 0x24c   :  { %2261 = vmatmul.msk.bf16.gmra.mxu3 %vm1009_vm7, %v1352_v9  ;;  %v1292_v41 = vadd.f32 %v1276_v15, %v698_v31 }
 0x24e   :  { %v1308_v54 = vmax.f32 %v1292_v41, 0.0 }
 0x24f   :  { %v1229_v62 = vpop.f32.mrf.mxu2 }
 0x250   :  { %v1259_v30 = vadd.f32 %v1229_v62, %v1140_v12  ;;  %v1340_v10 = vadd.f32 %v1324_v4, %v1308_v54  ;;  %v713_v54 = vadd.f32 %v3172_v43, %v3176_v20  ;;  %v1331_v20 = vld [vmem:[%s3590_s6 + $0x68] sm:$0xff] }
 0x251   :  { %v1144_v25 = vpop.f32.mrf.mxu1 }
 0x252   :  { %v1277_v52 = vadd.f32 %v3167_v34, %v1259_v30  ;;  %v1145_v39 = vadd.f32 %v1144_v25, %v1065_v28  ;;  %v1075_v22 = vpop.f32.mrf.mxu3 }
 0x254   :  { %v1293_v63 = vadd.f32 %v1277_v52, %v700_v47 }
 0x256   :  { %v1309_v44 = vmax.f32 %v1293_v63, 0.0 }
 0x257   :  { %v1232_v36 = vpop.f32.mrf.mxu2 }
 0x258   :  { %v1341_v11 = vadd.f32 %v1325_v2, %v1309_v44  ;;  %v1260_v33 = vadd.f32 %v1232_v36, %v1143_v8  ;;  %v715_v36 = vadd.f32 %v3172_v43, %v3186_v42 }
 0x259   :  { %v1147_v19 = vpop.f32.mrf.mxu1 }
 0x25a   :  { %v1353_v38 = vpack.c.bf16 %v1341_v11, %v1340_v10  ;;  %v1278_v60 = vadd.f32 %v3167_v34, %v1260_v33  ;;  %v1148_v57 = vadd.f32 %v1147_v19, %v1068_v5  ;;  %v1078_v11 = vpop.f32.mrf.mxu3 }
 0x25c   :  { %2262 = vmatmul.msk.bf16.gmra.mxu3 %vm1009_vm7, %v1353_v38  ;;  %v1294_v61 = vadd.f32 %v1278_v60, %v703_v1  ;;  %v1330_v38 = vld [vmem:[%s3590_s6 + $0x60] sm:$0xff] }
 0x25e   :  { %v1310_v7 = vmax.f32 %v1294_v61, 0.0 }
 0x25f   :  { %v1234_v3 = vpop.f32.mrf.mxu2 }
 0x260   :  { %v1261_v32 = vadd.f32 %v1234_v3, %v1145_v39  ;;  %v1342_v37 = vadd.f32 %v1326_v55, %v1310_v7 }
 0x261   :  { %v1149_v13 = vpop.f32.mrf.mxu1 }
 0x262   :  { %v1279_v0 = vadd.f32 %v3167_v34, %v1261_v32  ;;  %v1150_v17 = vadd.f32 %v1149_v13, %v1070_v6  ;;  %v718_v13 = vadd.f32 %v3172_v43, %v3194_v18 }
 0x264   :  { %v1295_v53 = vadd.f32 %v1279_v0, %v705_v48  ;;  %v1080_v0 = vpop.f32.mrf.mxu3 }
 0x266   :  { %v1311_v49 = vmax.f32 %v1295_v53, 0.0 }
 0x267   :  { %v1237_v23 = vpop.f32.mrf.mxu2 }
 0x268   :  { %v1343_v24 = vadd.f32 %v1327_v40, %v1311_v49  ;;  %v1262_v56 = vadd.f32 %v1237_v23, %v1148_v57  ;;  %v720_v40 = vadd.f32 %v3172_v43, %v3206_v14 }
 0x269   :  { %v1152_v35 = vpop.f32.mrf.mxu1 }
 0x26a   :  { %v1354_v26 = vpack.c.bf16 %v1343_v24, %v1342_v37  ;;  %v1280_v29 = vadd.f32 %v3167_v34, %v1262_v56  ;;  %v1153_v31 = vadd.f32 %v1152_v35, %v1073_v50  ;;  %v1332_v37 = vld [vmem:[%s3590_s6 + $0x70] sm:$0xff]  ;;  %v1333_v24 = vld [vmem:[%s3590_s6 + $0x78] sm:$0xff]  ;;  %s2432_s6 = smov 112  }
 0x26c   :  { %2263 = vmatmul.msk.bf16.gmra.mxu3 %vm1009_vm7, %v1354_v26  ;;  %v1296_v16 = vadd.f32 %v1280_v29, %v708_v59 }
 0x26e   :  { %v1312_v9 = vmax.f32 %v1296_v16, 0.0 }
 0x26f   :  { %v1239_v45 = vpop.f32.mrf.mxu2 }
 0x270   :  { %v1263_v27 = vadd.f32 %v1239_v45, %v1150_v17  ;;  %v1344_v30 = vadd.f32 %v1328_v46, %v1312_v9 }
 0x271   :  { %v1154_v62 = vpop.f32.mrf.mxu1 }
 0x272   :  { %v1281_v21 = vadd.f32 %v3167_v34, %v1263_v27  ;;  %v1155_v63 = vadd.f32 %v1154_v62, %v1075_v22 }
 0x274   :  { %v1297_v15 = vadd.f32 %v1281_v21, %v710_v58 }
 0x276   :  { %v1313_v12 = vmax.f32 %v1297_v15, 0.0 }
 0x277   :  { %v1242_v41 = vpop.f32.mrf.mxu2 }
 0x278   :  { %v1345_v28 = vadd.f32 %v1329_v51, %v1313_v12  ;;  %v1264_v25 = vadd.f32 %v1242_v41, %v1153_v31 }
 0x279   :  { %v1157_v44 = vpop.f32.mrf.mxu1 }
 0x27a   :  { %v1355_v47 = vpack.c.bf16 %v1345_v28, %v1344_v30  ;;  %v1282_v52 = vadd.f32 %v3167_v34, %v1264_v25  ;;  %v1158_v5 = vadd.f32 %v1157_v44, %v1078_v11 }
 0x27c   :  { %2264 = vmatmul.msk.bf16.gmra.mxu3 %vm1009_vm7, %v1355_v47  ;;  %v1298_v2 = vadd.f32 %v1282_v52, %v713_v54 }
 0x27e   :  { %v1314_v33 = vmax.f32 %v1298_v2, 0.0 }
 0x27f   :  { %v1244_v4 = vpop.f32.mrf.mxu2 }
 0x280   :  { %v1265_v8 = vadd.f32 %v1244_v4, %v1155_v63  ;;  %v1346_v39 = vadd.f32 %v1330_v38, %v1314_v33 }
 0x281   :  { %v1159_v32 = vpop.f32.mrf.mxu1 }
 0x282   :  { %v1283_v10 = vadd.f32 %v3167_v34, %v1265_v8  ;;  %v1160_v7 = vadd.f32 %v1159_v32, %v1080_v0 }
 0x284   :  { %v1299_v19 = vadd.f32 %v1283_v10, %v715_v36 }
 0x286   :  { %v1315_v60 = vmax.f32 %v1299_v19, 0.0 }
 0x287   :  { %v1247_v1 = vpop.f32.mrf.mxu2 }
 0x288   :  { %v1347_v3 = vadd.f32 %v1331_v20, %v1315_v60  ;;  %v1266_v61 = vadd.f32 %v1247_v1, %v1158_v5 }
 0x28a   :  { %v1356_v42 = vpack.c.bf16 %v1347_v3, %v1346_v39  ;;  %v1284_v48 = vadd.f32 %v3167_v34, %v1266_v61 }
 0x28c   :  { %2265 = vmatmul.msk.bf16.gmra.mxu3 %vm1009_vm7, %v1356_v42  ;;  %v1300_v6 = vadd.f32 %v1284_v48, %v718_v13 }
 0x28e   :  { %v1316_v49 = vmax.f32 %v1300_v6, 0.0 }
 0x28f   :  { %v1249_v53 = vpop.f32.mrf.mxu2 }
 0x290   :  { %v1267_v55 = vadd.f32 %v1249_v53, %v1160_v7  ;;  %v1348_v56 = vadd.f32 %v1332_v37, %v1316_v49 }
 0x292   :  { %v1285_v57 = vadd.f32 %v3167_v34, %v1267_v55  ;;  %v2337_v34 = vld [vmem:[%s3593_s9] ss:$0 sm:$0xff]  ;;  %s2433_s9 = smov 96  }
 0x294   :  { %v1301_v23 = vadd.f32 %v1285_v57, %v720_v40 }
 0x296   :  { %v1317_v18 = vmax.f32 %v1301_v23, 0.0 }
 0x298   :  { %v1349_v26 = vadd.f32 %v1333_v24, %v1317_v18 }
 0x29a   :  { %v1357_v29 = vpack.c.bf16 %v1349_v26, %v1348_v56  ;;  %v1451_v56 = vld [vmem:[%s3591_s7] sm:$0xff] }
 0x29c   :  { %2266 = vmatmul.msk.bf16.gmra.mxu3 %vm1009_vm7, %v1357_v29 }
 0x2af   :  { %v1403_v35 = vpop.f32.mrf.mxu3 }
 0x2b0   :  { %v1404_v14 = vadd.f32 %v2337_v34, %v1403_v35  ;;  %v1452_v35 = vld [vmem:[%s3591_s7 + $0x8] sm:$0xff] }
 0x2b7   :  { %v1405_v43 = vpop.f32.mrf.mxu3 }
 0x2b8   :  { %v1406_v59 = vadd.f32 %v2337_v34, %v1405_v43 }
 0x2ba   :  { %v3286_v17 = vpack.c.bf16 %v1406_v59, %v1404_v14  ;;  %v1453_v14 = vld [vmem:[%s3591_s7 + $0x10] sm:$0xff] }
 0x2bf   :  { %v1408_v50 = vpop.f32.mrf.mxu3 }
 0x2c0   :  { %v1409_v16 = vadd.f32 %v2337_v34, %v1408_v50 }
 0x2c7   :  { %v1410_v45 = vpop.f32.mrf.mxu3 }
 0x2c8   :  { %v1411_v27 = vadd.f32 %v2337_v34, %v1410_v45 }
 0x2ca   :  { %v3288_v58 = vpack.c.bf16 %v1411_v27, %v1409_v16  ;;  %v1455_v16 = vld [vmem:[%s3591_s7 + $0x20] sm:$0xff] }
 0x2cf   :  { %v1413_v21 = vpop.f32.mrf.mxu3 }
 0x2d0   :  { %v1414_v47 = vadd.f32 %v2337_v34, %v1413_v21 }
 0x2d7   :  { %v1415_v9 = vpop.f32.mrf.mxu3 }
 0x2d8   :  { %v1416_v25 = vadd.f32 %v2337_v34, %v1415_v9 }
 0x2da   :  { %v3294_v52 = vpack.c.bf16 %v1416_v25, %v1414_v47  ;;  %v1457_v25 = vld [vmem:[%s3591_s7 + $0x30] sm:$0xff]  ;;  %v1458_v47 = vld [vmem:[%s3591_s7 + $0x38] sm:$0xff] }
 0x2df   :  { %v1418_v15 = vpop.f32.mrf.mxu3 }
 0x2e0   :  { %v1419_v36 = vadd.f32 %v2337_v34, %v1418_v15 }
 0x2e7   :  { %v1420_v46 = vpop.f32.mrf.mxu3 }
 0x2e8   :  { %v1421_v8 = vadd.f32 %v2337_v34, %v1420_v46 }
 0x2ea   :  { %v3300_v10 = vpack.c.bf16 %v1421_v8, %v1419_v36 }
 0x2ef   :  { %v1423_v51 = vpop.f32.mrf.mxu3 }
 0x2f0   :  { %v1424_v5 = vadd.f32 %v2337_v34, %v1423_v51  ;;  %v1459_v51 = vld [vmem:[%s3591_s7 + $0x40] sm:$0xff] }
 0x2f7   :  { %v1425_v31 = vpop.f32.mrf.mxu3 }
 0x2f8   :  { %v1426_v20 = vadd.f32 %v2337_v34, %v1425_v31 }
 0x2fa   :  { %v1447_v60 = vpack.c.bf16 %v1426_v20, %v1424_v5  ;;  %v1461_v20 = vld [vmem:[%s3591_s7 + $0x50] sm:$0xff] }
 0x2ff   :  { %v1428_v12 = vpop.f32.mrf.mxu3 }
 0x300   :  { %v1429_v41 = vadd.f32 %v2337_v34, %v1428_v12 }
 0x307   :  { %v1430_v62 = vpop.f32.mrf.mxu3 }
 0x308   :  { %v1431_v30 = vadd.f32 %v2337_v34, %v1430_v62  ;;  %v1454_v62 = vld [vmem:[%s3591_s7 + $0x18] sm:$0xff] }
 0x30a   :  { %v3290_v28 = vpack.c.bf16 %v1431_v30, %v1429_v41  ;;  %v1456_v30 = vld [vmem:[%s3591_s7 + $0x28] sm:$0xff] }
 0x30c   :  { %1485 = vrot.lane.b32.xlu1 %v3290_v28, %s2432_s6 }
 0x30f   :  { %v1433_v22 = vpop.f32.mrf.mxu3 }
 0x310   :  { %v1434_v63 = vadd.f32 %v2337_v34, %v1433_v22 }
 0x314   :  { %1479 = vrot.lane.b32.xlu1 %v3294_v52, %s2432_s6 }
 0x317   :  { %v1435_v54 = vpop.f32.mrf.mxu3 }
 0x318   :  { %v1436_v4 = vadd.f32 %v2337_v34, %v1435_v54  ;;  %v1460_v54 = vld [vmem:[%s3591_s7 + $0x48] sm:$0xff] }
 0x31a   :  { %v1449_v2 = vpack.c.bf16 %v1436_v4, %v1434_v63 }
 0x31c   :  { %1960 = vrot.lane.b32.xlu1 %v1449_v2, %s2433_s9  ;;  %1487 = vrot.lane.b32.xlu0 %v1449_v2, %s2432_s6 }
 0x31f   :  { %v1438_v44 = vpop.f32.mrf.mxu3 }
 0x320   :  { %v1439_v33 = vadd.f32 %v2337_v34, %v1438_v44 }
 0x324   :  { %1481 = vrot.lane.b32.xlu0 %v3300_v10, %s2432_s6 }
 0x327   :  { %v1440_v11 = vpop.f32.mrf.mxu3 }
 0x328   :  { %v1441_v19 = vadd.f32 %v2337_v34, %v1440_v11 }
 0x32a   :  { %v1450_v38 = vpack.c.bf16 %v1441_v19, %v1439_v33 }
 0x32c   :  { %1489 = vrot.lane.b32.xlu2 %v1450_v38, %s2432_s6  ;;  %1475 = vrot.lane.b32.xlu0 %v3286_v17, %s2432_s6 }
 0x334   :  { %1483 = vrot.lane.b32.xlu2 %v1447_v60, %s2432_s6  ;;  %1958 = vrot.lane.b32.xlu0 %v3290_v28, %s2433_s9 }
 0x33c   :  { %1477 = vrot.lane.b32.xlu2 %v3288_v58, %s2432_s6  ;;  %1956 = vrot.lane.b32.xlu0 %v1447_v60, %s2433_s9 }
 0x344   :  { %1962 = vrot.lane.b32.xlu0 %v1450_v38, %s2433_s9 }
 0x34c   :  { %1952 = vrot.lane.b32.xlu0 %v3294_v52, %s2433_s9 }
 0x37e   :  { %v1486_v42 = vpop.permute.xlu1 %1485 }
 0x37f   :  { %v1531_v48 = vsel %vm1009_vm7, %v1486_v42, 0  ;;  %v1462_v42 = vld [vmem:[%s3591_s7 + $0x58] sm:$0xff] }
 0x386   :  { %v1490_v1 = vpop.permute.xlu2 %1489  ;;  %v1480_v55 = vpop.permute.xlu1 %1479 }
 0x387   :  { %v1537_v39 = vsel %vm1009_vm7, %v1490_v1, 0  ;;  %v1522_v57 = vsel %vm1009_vm7, %v1480_v55, 0 }
 0x388   :  { %1539 = vmatpush.bf16.xpose.msrb.mxu0 %v1537_v39 }
 0x38e   :  { %v1488_v3 = vpop.permute.xlu0 %1487  ;;  %v1484_v0 = vpop.permute.xlu2 %1483 }
 0x38f   :  { %v1534_v61 = vsel %vm1009_vm7, %v1488_v3, 0  ;;  %v1528_v7 = vsel %vm1009_vm7, %v1484_v0, 0  ;;  %v1961_v24 = vpop.permute.xlu1 %1960 }
 0x390   :  { %1540 = vmatpush.bf16.xpose.msrb.mxu0 %v1534_v61 }
 0x396   :  { %v1482_v32 = vpop.permute.xlu0 %1481  ;;  %v1478_v49 = vpop.permute.xlu2 %1477 }
 0x397   :  { %v1525_v6 = vsel %vm1009_vm7, %v1482_v32, 0  ;;  %v1519_v37 = vsel %vm1009_vm7, %v1478_v49, 0  ;;  %v1464_v49 = vld [vmem:[%s3591_s7 + $0x68] sm:$0xff] }
 0x398   :  { %1541 = vmatpush.bf16.xpose.msrb.mxu0 %v1531_v48 }
 0x39e   :  { %v1476_v13 = vpop.permute.xlu0 %1475 }
 0x39f   :  { %v1516_v18 = vsel %vm1009_vm7, %v1476_v13, 0 }
 0x3a0   :  { %1542 = vmatpush.bf16.xpose.msrb.mxu0 %v1528_v7 }
 0x3a6   :  { %v1959_v53 = vpop.permute.xlu0 %1958 }
 0x3a8   :  { %1543 = vmatpush.bf16.xpose.msrb.mxu0 %v1525_v6 }
 0x3ae   :  { %v1957_v40 = vpop.permute.xlu0 %1956 }
 0x3b0   :  { %1544 = vmatpush.bf16.xpose.msrb.mxu0 %v1522_v57 }
 0x3b6   :  { %v1963_v23 = vpop.permute.xlu0 %1962 }
 0x3b7   :  { %1972 = vmatpush.bf16.msra.mxu1 %v1963_v23 }
 0x3b8   :  { %1545 = vmatpush.bf16.xpose.msrb.mxu0 %v1519_v37 }
 0x3bb   :  { %1973 = vmatpush.bf16.msra.mxu1 %v1961_v24 }
 0x3be   :  { %v1953_v36 = vpop.permute.xlu0 %1952 }
 0x3bf   :  { %1974 = vmatpush.bf16.msra.mxu1 %v1959_v53 }
 0x3c0   :  { %1546 = vmatpush.bf16.xpose.msrb.mxu0 %v1516_v18 }
 0x3c3   :  { %1975 = vmatpush.bf16.msra.mxu1 %v1957_v40  ;;  %v1463_v40 = vld [vmem:[%s3591_s7 + $0x60] sm:$0xff] }
 0x3c7   :  { %2267 = vmatmul.msk.bf16.vlgmr.msrb.gmra.mxu0 %vm1009_vm7, %v3286_v17 }
 0x3d7   :  { %2268 = vmatmul.msk.bf16.gmra.mxu0 %vm1009_vm7, %v3288_v58 }
 0x3e7   :  { %2269 = vmatmul.msk.bf16.gmra.mxu0 %vm1009_vm7, %v3294_v52 }
 0x3f7   :  { %2270 = vmatmul.msk.bf16.gmra.mxu0 %vm1009_vm7, %v3300_v10 }
 0x407   :  { %2271 = vmatmul.msk.bf16.gmra.mxu0 %vm1009_vm7, %v1447_v60 }
 0x417   :  { %2272 = vmatmul.msk.bf16.gmra.mxu0 %vm1009_vm7, %v3290_v28 }
 0x427   :  { %2273 = vmatmul.msk.bf16.gmra.mxu0 %vm1009_vm7, %v1449_v2 }
 0x437   :  { %2274 = vmatmul.msk.bf16.gmra.mxu0 %vm1009_vm7, %v1450_v38 }
 0x444   :  { %v1548_v26 = vpop.f32.mrf.mxu0 }
 0x445   :  { %v1549_v29 = vadd.f32 %v1548_v26, %v1451_v56 }
 0x447   :  { %1588 = vmax.xlane.f32.xlu1 %v1549_v29 }
 0x44c   :  { %v1550_v34 = vpop.f32.mrf.mxu0 }
 0x44d   :  { %v1551_v43 = vadd.f32 %v1550_v34, %v1452_v35 }
 0x44f   :  { %1590 = vmax.xlane.f32.xlu2 %v1551_v43 }
 0x454   :  { %v1553_v59 = vpop.f32.mrf.mxu0 }
 0x455   :  { %v1554_v50 = vadd.f32 %v1553_v59, %v1453_v14 }
 0x457   :  { %1592 = vmax.xlane.f32.xlu0 %v1554_v50 }
 0x45c   :  { %v1555_v45 = vpop.f32.mrf.mxu0 }
 0x45d   :  { %v3360_v41 = vadd.f32 %v1555_v45, %v1454_v62 }
 0x464   :  { %v1558_v27 = vpop.f32.mrf.mxu0 }
 0x465   :  { %v1559_v21 = vadd.f32 %v1558_v27, %v1455_v16 }
 0x467   :  { %1954 = vrot.lane.b32.xlu2 %v3300_v10, %s2433_s9  ;;  %1596 = vmax.xlane.f32.xlu1 %v1559_v21 }
 0x46c   :  { %v1560_v9 = vpop.f32.mrf.mxu0 }
 0x46d   :  { %v3366_v28 = vadd.f32 %v1560_v9, %v1456_v30 }
 0x474   :  { %v1563_v15 = vpop.f32.mrf.mxu0 }
 0x475   :  { %v3372_v22 = vadd.f32 %v1563_v15, %v1457_v25  ;;  %v1465_v15 = vld [vmem:[%s3591_s7 + $0x70] sm:$0xff] }
 0x47c   :  { %v1565_v46 = vpop.f32.mrf.mxu0 }
 0x47d   :  { %v3378_v52 = vadd.f32 %v1565_v46, %v1458_v47 }
 0x484   :  { %v1568_v31 = vpop.f32.mrf.mxu0 }
 0x485   :  { %v3354_v12 = vadd.f32 %v1568_v31, %v1459_v51 }
 0x487   :  { %1604 = vmax.xlane.f32.xlu0 %v3354_v12 }
 0x48c   :  { %v1570_v63 = vpop.f32.mrf.mxu0 }
 0x48d   :  { %v3384_v4 = vadd.f32 %v1570_v63, %v1460_v54 }
 0x490   :  { %1594 = vmax.xlane.f32.xlu2 %v3360_v41 }
 0x494   :  { %v1573_v38 = vpop.f32.mrf.mxu0 }
 0x495   :  { %v3393_v39 = vadd.f32 %v1573_v38, %v1461_v20 }
 0x498   :  { %1598 = vmax.xlane.f32.xlu2 %v3366_v28 }
 0x49c   :  { %v1575_v32 = vpop.f32.mrf.mxu0 }
 0x49d   :  { %v3402_v48 = vadd.f32 %v1575_v32, %v1462_v42 }
 0x4a0   :  { %1600 = vmax.xlane.f32.xlu2 %v3372_v22 }
 0x4a4   :  { %v1578_v55 = vpop.f32.mrf.mxu0 }
 0x4a5   :  { %v3418_v57 = vadd.f32 %v1578_v55, %v1463_v40 }
 0x4a8   :  { %1602 = vmax.xlane.f32.xlu2 %v3378_v52 }
 0x4ac   :  { %v1580_v23 = vpop.f32.mrf.mxu0 }
 0x4ad   :  { %v3424_v37 = vadd.f32 %v1580_v23, %v1464_v49 }
 0x4b0   :  { %1606 = vmax.xlane.f32.xlu2 %v3384_v4 }
 0x4ba   :  { %v1589_v2 = vpop.xlane.xlu1 %1588 }
 0x4bb   :  { %v1620_v8 = vsub.f32 %v1549_v29, %v1589_v2 }
 0x4bd   :  { %v1636_v44 = vmul.f32 1.442695, %v1620_v8 }
 0x4bf   :  { %2339 = vpow2.f32 %v1636_v44 }
 0x4c2   :  { %v1591_v10 = vpop.xlane.xlu2 %1590 }
 0x4c3   :  { %v1621_v11 = vsub.f32 %v1551_v43, %v1591_v10 }
 0x4c5   :  { %v3387_v33 = vpop.eup %2339  ;;  %v1638_v19 = vmul.f32 1.442695, %v1621_v11 }
 0x4c6   :  { %1668 = vadd.xlane.f32.xlu2 %v3387_v33 }
 0x4c7   :  { %2341 = vpow2.f32 %v1638_v19 }
 0x4ca   :  { %v1955_v5 = vpop.permute.xlu2 %1954  ;;  %v1593_v60 = vpop.xlane.xlu0 %1592 }
 0x4cb   :  { %v1622_v1 = vsub.f32 %v1554_v50, %v1593_v60  ;;  %1976 = vmatpush.bf16.msra.mxu1 %v1955_v5 }
 0x4cd   :  { %v3395_v3 = vpop.eup %2341  ;;  %v1640_v61 = vmul.f32 1.442695, %v1622_v1 }
 0x4ce   :  { %1670 = vadd.xlane.f32.xlu1 %v3395_v3  ;;  %1608 = vmax.xlane.f32.xlu2 %v3393_v39 }
 0x4cf   :  { %2343 = vpow2.f32 %v1640_v61  ;;  %1977 = vmatpush.bf16.msra.mxu1 %v1953_v36 }
 0x4d5   :  { %v3404_v0 = vpop.eup %2343 }
 0x4d6   :  { %1610 = vmax.xlane.f32.xlu2 %v3402_v48  ;;  %1672 = vadd.xlane.f32.xlu0 %v3404_v0 }
 0x4da   :  { %v1597_v13 = vpop.xlane.xlu1 %1596 }
 0x4db   :  { %v1624_v7 = vsub.f32 %v1559_v21, %v1597_v13  ;;  %v1583_v21 = vpop.f32.mrf.mxu0 }
 0x4dc   :  { %v3444_v51 = vadd.f32 %v1583_v21, %v1465_v15 }
 0x4dd   :  { %v1644_v53 = vmul.f32 1.442695, %v1624_v7 }
 0x4df   :  { %2345 = vpow2.f32 %v1644_v53 }
 0x4e3   :  { %v1585_v30 = vpop.f32.mrf.mxu0 }
 0x4e5   :  { %v3408_v6 = vpop.eup %2345 }
 0x4e6   :  { %1676 = vadd.xlane.f32.xlu2 %v3408_v6 }
 0x4e7   :  { %1950 = vrot.lane.b32.xlu1 %v3288_v58, %s2433_s9 }
 0x4ea   :  { %1948 = vrot.lane.b32.xlu0 %v3286_v17, %s2433_s9 }
 0x4ee   :  { %1612 = vmax.xlane.f32.xlu2 %v3418_v57 }
 0x4f6   :  { %1614 = vmax.xlane.f32.xlu2 %v3424_v37 }
 0x4fa   :  { %v1605_v45 = vpop.xlane.xlu0 %1604 }
 0x4fb   :  { %v1628_v9 = vsub.f32 %v3354_v12, %v1605_v45  ;;  %v1466_v12 = vld [vmem:[%s3591_s7 + $0x78] sm:$0xff] }
 0x4fc   :  { %v3454_v25 = vadd.f32 %v1585_v30, %v1466_v12 }
 0x4fd   :  { %v1652_v46 = vmul.f32 1.442695, %v1628_v9 }
 0x503   :  { %v1595_v58 = vpop.xlane.xlu2 %1594 }
 0x504   :  { %v1623_v24 = vsub.f32 %v3360_v41, %v1595_v58 }
 0x506   :  { %v1642_v18 = vmul.f32 1.442695, %v1623_v24 }
 0x508   :  { %2347 = vpow2.f32 %v1642_v18 }
 0x50b   :  { %v1599_v56 = vpop.xlane.xlu2 %1598 }
 0x50c   :  { %v1625_v17 = vsub.f32 %v3366_v28, %v1599_v56 }
 0x50e   :  { %v1646_v26 = vmul.f32 1.442695, %v1625_v17  ;;  %v3429_v29 = vpop.eup %2347 }
 0x510   :  { %2349 = vpow2.f32 %v1646_v26 }
 0x511   :  { %1674 = vadd.xlane.f32.xlu1 %v3429_v29 }
 0x513   :  { %v1601_v35 = vpop.xlane.xlu2 %1600 }
 0x514   :  { %v1626_v34 = vsub.f32 %v3372_v22, %v1601_v35 }
 0x516   :  { %v3433_v43 = vpop.eup %2349  ;;  %v1648_v14 = vmul.f32 1.442695, %v1626_v34 }
 0x517   :  { %1678 = vadd.xlane.f32.xlu0 %v3433_v43 }
 0x518   :  { %2351 = vpow2.f32 %v1648_v14 }
 0x51b   :  { %v1603_v59 = vpop.xlane.xlu2 %1602 }
 0x51c   :  { %v1627_v50 = vsub.f32 %v3378_v52, %v1603_v59 }
 0x51e   :  { %v3437_v16 = vpop.eup %2351  ;;  %v1650_v27 = vmul.f32 1.442695, %v1627_v50 }
 0x51f   :  { %1680 = vadd.xlane.f32.xlu1 %v3437_v16 }
 0x520   :  { %2353 = vpow2.f32 %v1650_v27 }
 0x521   :  { %2355 = vpow2.f32 %v1652_v46 }
 0x523   :  { %v1607_v31 = vpop.xlane.xlu2 %1606 }
 0x524   :  { %v1629_v41 = vsub.f32 %v3384_v4, %v1607_v31 }
 0x526   :  { %v3446_v62 = vpop.eup %2353  ;;  %v1654_v28 = vmul.f32 1.442695, %v1629_v41 }
 0x527   :  { %1616 = vmax.xlane.f32.xlu1 %v3444_v51  ;;  %1682 = vadd.xlane.f32.xlu2 %v3446_v62  ;;  %v3456_v22 = vpop.eup %2355 }
 0x528   :  { %2357 = vpow2.f32 %v1654_v28 }
 0x52e   :  { %v3460_v47 = vpop.eup %2357 }
 0x52f   :  { %1618 = vmax.xlane.f32.xlu2 %v3454_v25  ;;  %1684 = vadd.xlane.f32.xlu1 %v3456_v22 }
 0x537   :  { %1686 = vadd.xlane.f32.xlu2 %v3460_v47 }
 0x539   :  { %v1669_v52 = vpop.xlane.xlu2 %1668 }
 0x53a   :  { %2359 = vrcp.f32 %v1669_v52  ;;  %vm1705_vm12 = vweird.f32 %v1669_v52  ;;  %v1709_v55 = vand.u32 2147483647, %v1669_v52 }
 0x53c   :  { %vm1710_vm15 = vcmp.eq.f32.partialorder %v1709_v55, 8.507059e+37 }
 0x540   :  { %v2360_v2 = vpop.eup %2359 }
 0x541   :  { %v1609_v54 = vpop.xlane.xlu2 %1608  ;;  %v1671_v63 = vpop.xlane.xlu1 %1670  ;;  %v1701_v44 = vmul.f32 %v2360_v2, %v1669_v52  ;;  %vm1706_vm9 = vweird.f32 %v2360_v2 }
 0x542   :  { %v1630_v4 = vsub.f32 %v3393_v39, %v1609_v54  ;;  %2361 = vrcp.f32 %v1671_v63  ;;  %v1725_v42 = vand.u32 2147483648, %v1671_v63  ;;  %vm1719_vm10 = vweird.f32 %v1671_v63  ;;  %vm1707_vm13 = vmor %vm1705_vm12, %vm1706_vm9 }
 0x543   :  { %v1702_v38 = vsub.f32 1.0, %v1701_v44  ;;  %v1723_v13 = vand.u32 2147483647, %v1671_v63 }
 0x544   :  { %v1656_v8 = vmul.f32 1.442695, %v1630_v4  ;;  %v1726_v49 = vor.u32 1.1754944e-38, %v1725_v42 }
 0x545   :  { %v1703_v39 = vmul.f32 %v2360_v2, %v1702_v38  ;;  %vm1724_vm14 = vcmp.eq.f32.partialorder %v1723_v13, 8.507059e+37 }
 0x546   :  { %2363 = vpow2.f32 %v1656_v8 }
 0x547   :  { %v1704_v32 = vadd.f32 %v2360_v2, %v1703_v39 }
 0x548   :  { %v2362_v36 = vpop.eup %2361 }
 0x549   :  { %v1715_v10 = vmul.f32 %v2362_v36, %v1671_v63  ;;  %v1611_v11 = vpop.xlane.xlu2 %1610  ;;  %vm1720_vm8 = vweird.f32 %v2362_v36  ;;  %v1673_v53 = vpop.xlane.xlu0 %1672  ;;  %v1708_v23 = vsel %vm1707_vm13, %v2360_v2, %v1704_v32 }
 0x54a   :  { %v1631_v19 = vsub.f32 %v3402_v48, %v1611_v11  ;;  %v1711_v48 = vand.u32 2147483648, %v1669_v52  ;;  %vm1721_vm11 = vmor %vm1719_vm10, %vm1720_vm8  ;;  %vm1733_vm1 = vweird.f32 %v1673_v53  ;;  %v1739_v54 = vand.u32 2147483648, %v1673_v53 }
 0x54b   :  { %v1716_v20 = vsub.f32 1.0, %v1715_v10  ;;  %v1737_v4 = vand.u32 2147483647, %v1673_v53 }
 0x54c   :  { %v3465_v5 = vpop.eup %2363  ;;  %v1658_v60 = vmul.f32 1.442695, %v1631_v19  ;;  %v1712_v58 = vor.u32 1.1754944e-38, %v1711_v48  ;;  %v1740_v38 = vor.u32 1.1754944e-38, %v1739_v54 }
 0x54d   :  { %v1717_v1 = vmul.f32 %v2362_v36, %v1716_v20  ;;  %1688 = vadd.xlane.f32.xlu0 %v3465_v5  ;;  %vm1738_vm4 = vcmp.eq.f32.partialorder %v1737_v4, 8.507059e+37 }
 0x54e   :  { %2365 = vpow2.f32 %v1658_v60  ;;  %v1713_v17 = vsel %vm1710_vm15, %v1712_v58, %v1708_v23 }
 0x54f   :  { %v1718_v61 = vadd.f32 %v2362_v36, %v1717_v1  ;;  %v1924_v34 = vmul.f32 %v3387_v33, %v1713_v17 }
 0x551   :  { %v1722_v40 = vsel %vm1721_vm11, %v2362_v36, %v1718_v61 }
 0x552   :  { %v1727_v24 = vsel %vm1724_vm14, %v1726_v49, %v1722_v40 }
 0x553   :  { %v1925_v26 = vmul.f32 %v3395_v3, %v1727_v24 }
 0x554   :  { %v3468_v7 = vpop.eup %2365 }
 0x555   :  { %1690 = vadd.xlane.f32.xlu1 %v3468_v7  ;;  %v1940_v14 = vpack.c.bf16 %v1925_v26, %v1924_v34 }
 0x559   :  { %v3471_v18 = vpop.xlane.xlu2 %1676  ;;  %v1951_v56 = vpop.permute.xlu1 %1950 }
 0x55a   :  { %1978 = vmatpush.bf16.msra.mxu1 %v1951_v56  ;;  %v1767_v34 = vand.u32 2147483648, %v3471_v18  ;;  %vm1761_vm13 = vweird.f32 %v3471_v18 }
 0x55c   :  { %v1949_v35 = vpop.permute.xlu0 %1948 }
 0x55e   :  { %1979 = vmatpush.bf16.msra.mxu1 %v1949_v35 }
 0x561   :  { %v1613_v59 = vpop.xlane.xlu2 %1612  ;;  %1980 = vmatmul.bf16.vlgmr.msra.gmra.mxu1 %v1940_v14  ;;  %v1765_v14 = vand.u32 2147483647, %v3471_v18 }
 0x562   :  { %v1632_v50 = vsub.f32 %v3418_v57, %v1613_v59 }
 0x564   :  { %v1660_v45 = vmul.f32 1.442695, %v1632_v50 }
 0x566   :  { %2367 = vpow2.f32 %v1660_v45 }
 0x569   :  { %v1615_v27 = vpop.xlane.xlu2 %1614 }
 0x56a   :  { %v1633_v21 = vsub.f32 %v3424_v37, %v1615_v27 }
 0x56c   :  { %v3477_v9 = vpop.eup %2367  ;;  %v1662_v15 = vmul.f32 1.442695, %v1633_v21 }
 0x56d   :  { %1692 = vadd.xlane.f32.xlu2 %v3477_v9 }
 0x56e   :  { %2369 = vpow2.f32 %v1662_v15  ;;  %v1768_v15 = vor.u32 1.1754944e-38, %v1767_v34 }
 0x56f   :  { %2371 = vrcp.f32 %v1673_v53 }
 0x574   :  { %v3480_v3 = vpop.eup %2369 }
 0x575   :  { %1694 = vadd.xlane.f32.xlu0 %v3480_v3  ;;  %v2372_v33 = vpop.eup %2371 }
 0x576   :  { %v1729_v46 = vmul.f32 %v2372_v33, %v1673_v53  ;;  %vm1734_vm0 = vweird.f32 %v2372_v33 }
 0x577   :  { %vm3486_vm2 = vmor %vm1733_vm1, %vm1734_vm0  ;;  %vm1766_vm0 = vcmp.eq.f32.partialorder %v1765_v14, 8.507059e+37 }
 0x578   :  { %v1730_v31 = vsub.f32 1.0, %v1729_v46 }
 0x57a   :  { %v1731_v41 = vmul.f32 %v2372_v33, %v1730_v31 }
 0x57c   :  { %v1732_v30 = vadd.f32 %v2372_v33, %v1731_v41 }
 0x57e   :  { %v1736_v44 = vsel %vm3486_vm2, %v2372_v33, %v1732_v30 }
 0x57f   :  { %v1741_v61 = vsel %vm1738_vm4, %v1740_v38, %v1736_v44 }
 0x580   :  { %v1926_v55 = vmul.f32 %v3404_v0, %v1741_v61 }
 0x584   :  { %v1675_v57 = vpop.xlane.xlu1 %1674 }
 0x585   :  { %2373 = vrcp.f32 %v1675_v57  ;;  %v1753_v8 = vand.u32 2147483648, %v1675_v57  ;;  %v1751_v11 = vand.u32 2147483647, %v1675_v57  ;;  %vm1747_vm5 = vweird.f32 %v1675_v57 }
 0x586   :  { %2375 = vrcp.f32 %v3471_v18 }
 0x587   :  { %v1754_v39 = vor.u32 1.1754944e-38, %v1753_v8  ;;  %vm1752_vm8 = vcmp.eq.f32.partialorder %v1751_v11, 8.507059e+37 }
 0x58a   :  { %v1679_v37 = vpop.xlane.xlu0 %1678 }
 0x58b   :  { %v2374_v12 = vpop.eup %2373  ;;  %2377 = vrcp.f32 %v1679_v37  ;;  %v1781_v17 = vand.u32 2147483648, %v1679_v37  ;;  %vm1775_vm11 = vweird.f32 %v1679_v37 }
 0x58c   :  { %v1743_v28 = vmul.f32 %v2374_v12, %v1675_v57  ;;  %v3484_v52 = vpop.eup %2375  ;;  %vm1748_vm3 = vweird.f32 %v2374_v12 }
 0x58d   :  { %v1757_v36 = vmul.f32 %v3484_v52, %v3471_v18  ;;  %vm1749_vm6 = vmor %vm1747_vm5, %vm1748_vm3  ;;  %vm1762_vm10 = vweird.f32 %v3484_v52  ;;  %v1782_v45 = vor.u32 1.1754944e-38, %v1781_v17 }
 0x58e   :  { %v1744_v2 = vsub.f32 1.0, %v1743_v28  ;;  %vm1763_vm14 = vmor %vm1761_vm13, %vm1762_vm10 }
 0x58f   :  { %v1758_v42 = vsub.f32 1.0, %v1757_v36 }
 0x590   :  { %v1745_v10 = vmul.f32 %v2374_v12, %v1744_v2 }
 0x591   :  { %v2378_v19 = vpop.eup %2377  ;;  %v1759_v49 = vmul.f32 %v3484_v52, %v1758_v42 }
 0x592   :  { %v1746_v20 = vadd.f32 %v2374_v12, %v1745_v10  ;;  %v1771_v60 = vmul.f32 %v2378_v19, %v1679_v37  ;;  %v3494_v1 = vpop.xlane.xlu1 %1680  ;;  %vm1776_vm9 = vweird.f32 %v2378_v19 }
 0x593   :  { %2379 = vrcp.f32 %v3494_v1  ;;  %v1760_v0 = vadd.f32 %v3484_v52, %v1759_v49  ;;  %vm1777_vm12 = vmor %vm1775_vm11, %vm1776_vm9  ;;  %v1795_v11 = vand.u32 2147483648, %v3494_v1  ;;  %vm1789_vm5 = vweird.f32 %v3494_v1 }
 0x594   :  { %v1772_v32 = vsub.f32 1.0, %v1771_v60  ;;  %v1750_v13 = vsel %vm1749_vm6, %v2374_v12, %v1746_v20 }
 0x595   :  { %v1755_v48 = vsel %vm1752_vm8, %v1754_v39, %v1750_v13  ;;  %v1796_v42 = vor.u32 1.1754944e-38, %v1795_v11 }
 0x596   :  { %v1773_v53 = vmul.f32 %v2378_v19, %v1772_v32  ;;  %v1927_v40 = vmul.f32 %v3429_v29, %v1755_v48  ;;  %v1779_v29 = vand.u32 2147483647, %v1679_v37 }
 0x598   :  { %v1941_v23 = vpack.c.bf16 %v1927_v40, %v1926_v55  ;;  %v1774_v58 = vadd.f32 %v2378_v19, %v1773_v53  ;;  %vm1780_vm15 = vcmp.eq.f32.partialorder %v1779_v29, 8.507059e+37 }
 0x599   :  { %v3506_v35 = vpop.eup %2379 }
 0x59a   :  { %v3500_v24 = vpop.xlane.xlu2 %1682  ;;  %v1617_v56 = vpop.xlane.xlu1 %1616  ;;  %1985 = vmatmul.bf16.gmra.mxu1 %v1941_v23  ;;  %v1778_v50 = vsel %vm1777_vm12, %v2378_v19, %v1774_v58  ;;  %v1785_v27 = vmul.f32 %v3506_v35, %v3494_v1  ;;  %vm1790_vm2 = vweird.f32 %v3506_v35  ;;  %v1793_v19 = vand.u32 2147483647, %v3494_v1  ;;  %v2299_v23 = vld [vmem:[%s3594_s10] sm:$0xff] }
 0x59b   :  { %2381 = vrcp.f32 %v3500_v24  ;;  %v1634_v26 = vsub.f32 %v3444_v51, %v1617_v56  ;;  %v1764_v51 = vsel %vm1763_vm14, %v3484_v52, %v1760_v0  ;;  %v1783_v33 = vsel %vm1780_vm15, %v1782_v45, %v1778_v50  ;;  %vm1791_vm6 = vmor %vm1789_vm5, %vm1790_vm2  ;;  %2072 = vmatpush.bf16.msra.mxu2 %v2299_v23 }
 0x59c   :  { %v1769_v41 = vsel %vm1766_vm0, %v1768_v15, %v1764_v51  ;;  %v1786_v37 = vsub.f32 1.0, %v1785_v27  ;;  %v1929_v30 = vmul.f32 %v3433_v43, %v1783_v33  ;;  %v1809_v43 = vand.u32 2147483648, %v3500_v24 }
 0x59d   :  { %v1664_v59 = vmul.f32 1.442695, %v1634_v26  ;;  %v1928_v63 = vmul.f32 %v3408_v6, %v1769_v41  ;;  %vm1803_vm3 = vweird.f32 %v3500_v24  ;;  %v1807_v6 = vand.u32 2147483647, %v3500_v24 }
 0x59e   :  { %v1810_v20 = vor.u32 1.1754944e-38, %v1809_v43  ;;  %vm1794_vm9 = vcmp.eq.f32.partialorder %v1793_v19, 8.507059e+37 }
 0x59f   :  { %2383 = vpow2.f32 %v1664_v59  ;;  %v1942_v4 = vpack.c.bf16 %v1929_v30, %v1928_v63  ;;  %vm1808_vm8 = vcmp.eq.f32.partialorder %v1807_v6, 8.507059e+37 }
 0x5a1   :  { %v2382_v21 = vpop.eup %2381 }
 0x5a2   :  { %v1799_v46 = vmul.f32 %v2382_v21, %v3500_v24  ;;  %v1619_v31 = vpop.xlane.xlu2 %1618  ;;  %v3516_v57 = vpop.xlane.xlu1 %1684  ;;  %vm1804_vm1 = vweird.f32 %v2382_v21 }
 0x5a3   :  { %v1635_v18 = vsub.f32 %v3454_v25, %v1619_v31  ;;  %2385 = vrcp.f32 %v3516_v57  ;;  %v1787_v25 = vmul.f32 %v3506_v35, %v1786_v37  ;;  %vm1805_vm4 = vmor %vm1803_vm3, %vm1804_vm1  ;;  %vm1817_vm14 = vweird.f32 %v3516_v57 }
 0x5a4   :  { %v1800_v12 = vsub.f32 1.0, %v1799_v46 }
 0x5a5   :  { %v1666_v28 = vmul.f32 1.442695, %v1635_v18  ;;  %v3519_v54 = vpop.eup %2383  ;;  %v1788_v36 = vadd.f32 %v3506_v35, %v1787_v25 }
 0x5a6   :  { %v1801_v52 = vmul.f32 %v2382_v21, %v1800_v12  ;;  %1696 = vadd.xlane.f32.xlu1 %v3519_v54 }
 0x5a7   :  { %2387 = vpow2.f32 %v1666_v28  ;;  %v1792_v39 = vsel %vm1791_vm6, %v3506_v35, %v1788_v36 }
 0x5a8   :  { %v1802_v2 = vadd.f32 %v2382_v21, %v1801_v52  ;;  %v1797_v48 = vsel %vm1794_vm9, %v1796_v42, %v1792_v39 }
 0x5a9   :  { %v2386_v44 = vpop.eup %2385  ;;  %v1930_v49 = vmul.f32 %v3437_v16, %v1797_v48  ;;  %v1821_v16 = vand.u32 2147483647, %v3516_v57 }
 0x5aa   :  { %v1687_v8 = vpop.xlane.xlu2 %1686  ;;  %1990 = vmatmul.bf16.gmra.mxu1 %v1942_v4  ;;  %v1806_v38 = vsel %vm1805_vm4, %v2382_v21, %v1802_v2  ;;  %v1813_v60 = vmul.f32 %v2386_v44, %v3516_v57  ;;  %vm1818_vm11 = vweird.f32 %v2386_v44 }
 0x5ab   :  { %2389 = vrcp.f32 %v1687_v8  ;;  %v1811_v32 = vsel %vm1808_vm8, %v1810_v20, %v1806_v38  ;;  %v1837_v17 = vand.u32 2147483648, %v1687_v8  ;;  %vm1831_vm12 = vweird.f32 %v1687_v8  ;;  %vm1819_vm15 = vmor %vm1817_vm14, %vm1818_vm11 }
 0x5ac   :  { %v1814_v53 = vsub.f32 1.0, %v1813_v60  ;;  %v1931_v1 = vmul.f32 %v3446_v62, %v1811_v32  ;;  %v1835_v29 = vand.u32 2147483647, %v1687_v8  ;;  %v1823_v62 = vand.u32 2147483648, %v3516_v57 }
 0x5ad   :  { %v3530_v10 = vpop.eup %2387  ;;  %v1838_v35 = vor.u32 1.1754944e-38, %v1837_v17  ;;  %vm1822_vm1 = vcmp.eq.f32.partialorder %v1821_v16, 8.507059e+37 }
 0x5ae   :  { %1698 = vadd.xlane.f32.xlu2 %v3530_v10  ;;  %v1815_v58 = vmul.f32 %v2386_v44, %v1814_v53  ;;  %v1943_v24 = vpack.c.bf16 %v1931_v1, %v1930_v49  ;;  %vm1836_vm0 = vcmp.eq.f32.partialorder %v1835_v29, 8.507059e+37  ;;  %v1824_v59 = vor.u32 1.1754944e-38, %v1823_v62 }
 0x5b0   :  { %v1816_v0 = vadd.f32 %v2386_v44, %v1815_v58 }
 0x5b1   :  { %v2390_v61 = vpop.eup %2389 }
 0x5b2   :  { %v1827_v13 = vmul.f32 %v2390_v61, %v1687_v8  ;;  %vm1832_vm10 = vweird.f32 %v2390_v61  ;;  %v1820_v14 = vsel %vm1819_vm15, %v2386_v44, %v1816_v0 }
 0x5b3   :  { %vm1833_vm13 = vmor %vm1831_vm12, %vm1832_vm10  ;;  %v1825_v45 = vsel %vm1822_vm1, %v1824_v59, %v1820_v14 }
 0x5b4   :  { %v1828_v55 = vsub.f32 1.0, %v1827_v13  ;;  %v1932_v51 = vmul.f32 %v3456_v22, %v1825_v45 }
 0x5b6   :  { %v1829_v40 = vmul.f32 %v2390_v61, %v1828_v55 }
 0x5b8   :  { %v1830_v56 = vadd.f32 %v2390_v61, %v1829_v40 }
 0x5ba   :  { %1995 = vmatmul.bf16.gmra.mxu1 %v1943_v24  ;;  %v1834_v26 = vsel %vm1833_vm13, %v2390_v61, %v1830_v56 }
 0x5bb   :  { %v1839_v50 = vsel %vm1836_vm0, %v1838_v35, %v1834_v26 }
 0x5bc   :  { %v1933_v27 = vmul.f32 %v3460_v47, %v1839_v50 }
 0x5be   :  { %v1944_v46 = vpack.c.bf16 %v1933_v27, %v1932_v51 }
 0x5c0   :  { %v1689_v34 = vpop.xlane.xlu0 %1688 }
 0x5c1   :  { %2391 = vrcp.f32 %v1689_v34  ;;  %v1851_v12 = vand.u32 2147483648, %v1689_v34  ;;  %vm1845_vm3 = vweird.f32 %v1689_v34  ;;  %v1849_v30 = vand.u32 2147483647, %v1689_v34 }
 0x5c3   :  { %v1852_v25 = vor.u32 1.1754944e-38, %v1851_v12  ;;  %vm1850_vm6 = vcmp.eq.f32.partialorder %v1849_v30, 8.507059e+37 }
 0x5c7   :  { %v2392_v21 = vpop.eup %2391 }
 0x5c8   :  { %v1841_v15 = vmul.f32 %v2392_v21, %v1689_v34  ;;  %v1691_v33 = vpop.xlane.xlu1 %1690  ;;  %vm1846_vm2 = vweird.f32 %v2392_v21 }
 0x5c9   :  { %2393 = vrcp.f32 %v1691_v33  ;;  %vm1847_vm4 = vmor %vm1845_vm3, %vm1846_vm2  ;;  %v1865_v47 = vand.u32 2147483648, %v1691_v33  ;;  %v1863_v22 = vand.u32 2147483647, %v1691_v33  ;;  %vm1859_vm8 = vweird.f32 %v1691_v33 }
 0x5ca   :  { %v1842_v31 = vsub.f32 1.0, %v1841_v15  ;;  %2000 = vmatmul.bf16.gmra.mxu1 %v1944_v46 }
 0x5cb   :  { %v1866_v2 = vor.u32 1.1754944e-38, %v1865_v47  ;;  %vm1864_vm10 = vcmp.eq.f32.partialorder %v1863_v22, 8.507059e+37 }
 0x5cc   :  { %v1843_v18 = vmul.f32 %v2392_v21, %v1842_v31 }
 0x5ce   :  { %v1844_v41 = vadd.f32 %v2392_v21, %v1843_v18 }
 0x5cf   :  { %v2394_v57 = vpop.eup %2393 }
 0x5d0   :  { %v1855_v37 = vmul.f32 %v2394_v57, %v1691_v33  ;;  %vm1860_vm5 = vweird.f32 %v2394_v57  ;;  %v1848_v63 = vsel %vm1847_vm4, %v2392_v21, %v1844_v41 }
 0x5d1   :  { %vm1861_vm9 = vmor %vm1859_vm8, %vm1860_vm5  ;;  %v1853_v8 = vsel %vm1850_vm6, %v1852_v25, %v1848_v63 }
 0x5d2   :  { %v1856_v28 = vsub.f32 1.0, %v1855_v37  ;;  %v1934_v36 = vmul.f32 %v3465_v5, %v1853_v8 }
 0x5d4   :  { %v1857_v52 = vmul.f32 %v2394_v57, %v1856_v28 }
 0x5d6   :  { %v1858_v4 = vadd.f32 %v2394_v57, %v1857_v52 }
 0x5d8   :  { %v1862_v43 = vsel %vm1861_vm9, %v2394_v57, %v1858_v4 }
 0x5d9   :  { %v1867_v44 = vsel %vm1864_vm10, %v1866_v2, %v1862_v43 }
 0x5da   :  { %v1935_v6 = vmul.f32 %v3468_v7, %v1867_v44 }
 0x5dc   :  { %v1945_v11 = vpack.c.bf16 %v1935_v6, %v1934_v36 }
 0x5de   :  { %v1981_v19 = vpop.f32.mrf.mxu1  ;;  %2005 = vmatmul.bf16.gmra.mxu1 %v1945_v11 }
 0x5e0   :  { %v1693_v38 = vpop.xlane.xlu2 %1692 }
 0x5e1   :  { %2395 = vrcp.f32 %v1693_v38  ;;  %v1879_v7 = vand.u32 2147483648, %v1693_v38  ;;  %vm1873_vm12 = vweird.f32 %v1693_v38  ;;  %v1877_v55 = vand.u32 2147483647, %v1693_v38 }
 0x5e3   :  { %v1880_v24 = vor.u32 1.1754944e-38, %v1879_v7  ;;  %vm1878_vm15 = vcmp.eq.f32.partialorder %v1877_v55, 8.507059e+37 }
 0x5e6   :  { %v1983_v20 = vpop.f32.mrf.mxu1 }
 0x5e7   :  { %v2396_v60 = vpop.eup %2395  ;;  %v2021_v39 = vpack.c.bf16 %v1983_v20, %v1981_v19 }
 0x5e8   :  { %v1869_v61 = vmul.f32 %v2396_v60, %v1693_v38  ;;  %v1695_v42 = vpop.xlane.xlu0 %1694  ;;  %vm1874_vm11 = vweird.f32 %v2396_v60 }
 0x5e9   :  { %2397 = vrcp.f32 %v1695_v42  ;;  %2279 = vmatmul.msk.bf16.vlgmr.msra.gmra.mxu2 %vm1009_vm7, %v2021_v39  ;;  %vm1875_vm13 = vmor %vm1873_vm12, %vm1874_vm11  ;;  %v1893_v40 = vand.u32 2147483648, %v1695_v42  ;;  %v1891_v23 = vand.u32 2147483647, %v1695_v42  ;;  %vm1887_vm0 = vweird.f32 %v1695_v42 }
 0x5ea   :  { %v1870_v32 = vsub.f32 1.0, %v1869_v61  ;;  %vm2114_vm12 = vcmask 261120  }
 0x5eb   :  { %v1894_v17 = vor.u32 1.1754944e-38, %v1893_v40  ;;  %vm1892_vm2 = vcmp.eq.f32.partialorder %v1891_v23, 8.507059e+37 }
 0x5ec   :  { %v1871_v13 = vmul.f32 %v2396_v60, %v1870_v32 }
 0x5ee   :  { %v1872_v53 = vadd.f32 %v2396_v60, %v1871_v13 }
 0x5ef   :  { %v2398_v48 = vpop.eup %2397 }
 0x5f0   :  { %v1883_v5 = vmul.f32 %v2398_v48, %v1695_v42  ;;  %vm1888_vm14 = vweird.f32 %v2398_v48  ;;  %v1876_v58 = vsel %vm1875_vm13, %v2396_v60, %v1872_v53 }
 0x5f1   :  { %vm1889_vm1 = vmor %vm1887_vm0, %vm1888_vm14  ;;  %v1881_v0 = vsel %vm1878_vm15, %v1880_v24, %v1876_v58 }
 0x5f2   :  { %v1884_v1 = vsub.f32 1.0, %v1883_v5  ;;  %v1936_v16 = vmul.f32 %v3477_v9, %v1881_v0 }
 0x5f4   :  { %v1885_v49 = vmul.f32 %v2398_v48, %v1884_v1 }
 0x5f6   :  { %v1886_v56 = vadd.f32 %v2398_v48, %v1885_v49 }
 0x5f8   :  { %v1890_v29 = vsel %vm1889_vm1, %v2398_v48, %v1886_v56 }
 0x5f9   :  { %v1895_v62 = vsel %vm1892_vm2, %v1894_v17, %v1890_v29 }
 0x5fa   :  { %v1937_v26 = vmul.f32 %v3480_v3, %v1895_v62 }
 0x5fc   :  { %v1946_v35 = vpack.c.bf16 %v1937_v26, %v1936_v16 }
 0x5fe   :  { %2010 = vmatmul.bf16.gmra.mxu1 %v1946_v35 }
 0x617   :  { %v1986_v34 = vpop.f32.mrf.mxu1 }
 0x619   :  { %v1697_v14 = vpop.xlane.xlu1 %1696 }
 0x61a   :  { %2399 = vrcp.f32 %v1697_v14  ;;  %v1907_v31 = vand.u32 2147483648, %v1697_v14  ;;  %vm1901_vm4 = vweird.f32 %v1697_v14  ;;  %v1905_v18 = vand.u32 2147483647, %v1697_v14 }
 0x61c   :  { %v1908_v28 = vor.u32 1.1754944e-38, %v1907_v31  ;;  %vm1906_vm8 = vcmp.eq.f32.partialorder %v1905_v18, 8.507059e+37 }
 0x61f   :  { %v1988_v59 = vpop.f32.mrf.mxu1 }
 0x620   :  { %v2022_v50 = vpack.c.bf16 %v1988_v59, %v1986_v34  ;;  %v2400_v45 = vpop.eup %2399 }
 0x621   :  { %v1699_v27 = vpop.xlane.xlu2 %1698  ;;  %v1897_v51 = vmul.f32 %v2400_v45, %v1697_v14  ;;  %vm1902_vm3 = vweird.f32 %v2400_v45 }
 0x622   :  { %2401 = vrcp.f32 %v1699_v27  ;;  %2280 = vmatmul.msk.bf16.gmra.mxu2 %vm1009_vm7, %v2022_v50  ;;  %vm1903_vm5 = vmor %vm1901_vm4, %vm1902_vm3  ;;  %v1921_v41 = vand.u32 2147483648, %v1699_v27  ;;  %v1919_v30 = vand.u32 2147483647, %v1699_v27  ;;  %vm1915_vm9 = vweird.f32 %v1699_v27 }
 0x623   :  { %v1898_v21 = vsub.f32 1.0, %v1897_v51 }
 0x624   :  { %v1922_v22 = vor.u32 1.1754944e-38, %v1921_v41  ;;  %vm1920_vm11 = vcmp.eq.f32.partialorder %v1919_v30, 8.507059e+37 }
 0x625   :  { %v1899_v15 = vmul.f32 %v2400_v45, %v1898_v21 }
 0x627   :  { %v1991_v33 = vpop.f32.mrf.mxu1  ;;  %v1900_v9 = vadd.f32 %v2400_v45, %v1899_v15 }
 0x628   :  { %v2402_v46 = vpop.eup %2401 }
 0x629   :  { %v1911_v3 = vmul.f32 %v2402_v46, %v1699_v27  ;;  %v1904_v37 = vsel %vm1903_vm5, %v2400_v45, %v1900_v9  ;;  %vm1916_vm6 = vweird.f32 %v2402_v46 }
 0x62a   :  { %vm1917_vm10 = vmor %vm1915_vm9, %vm1916_vm6  ;;  %v1909_v25 = vsel %vm1906_vm8, %v1908_v28, %v1904_v37 }
 0x62b   :  { %v1912_v57 = vsub.f32 1.0, %v1911_v3  ;;  %v1938_v8 = vmul.f32 %v3519_v54, %v1909_v25  ;;  %v2338_v54 = vld [vmem:[%s3595_s11] ss:$0 sm:$0xff]  ;;  %s2434_s11 = smov [#allocation2]  }
 0x62c   :  { %s2135_s28 = sshll.u32 %s2434_s11, 4  ;;  %s2136_s28 = int_to_ptr.vmem [resolvable:$true] %s2135_s28 }
 0x62d   :  { %v1913_v12 = vmul.f32 %v2402_v46, %v1912_v57 }
 0x62f   :  { %v1914_v47 = vadd.f32 %v2402_v46, %v1913_v12  ;;  %v1993_v52 = vpop.f32.mrf.mxu1 }
 0x630   :  { %v2023_v63 = vpack.c.bf16 %v1993_v52, %v1991_v33 }
 0x631   :  { %v1918_v4 = vsel %vm1917_vm10, %v2402_v46, %v1914_v47 }
 0x632   :  { %2281 = vmatmul.msk.bf16.gmra.mxu2 %vm1009_vm7, %v2023_v63  ;;  %v1923_v2 = vsel %vm1920_vm11, %v1922_v22, %v1918_v4 }
 0x633   :  { %v1939_v43 = vmul.f32 %v3530_v10, %v1923_v2 }
 0x635   :  { %v1947_v44 = vpack.c.bf16 %v1939_v43, %v1938_v8 }
 0x637   :  { %v1996_v36 = vpop.f32.mrf.mxu1  ;;  %2015 = vmatmul.bf16.gmra.mxu1 %v1947_v44 }
 0x63f   :  { %v1998_v6 = vpop.f32.mrf.mxu1 }
 0x640   :  { %v2024_v11 = vpack.c.bf16 %v1998_v6, %v1996_v36 }
 0x642   :  { %2282 = vmatmul.msk.bf16.gmra.mxu2 %vm1009_vm7, %v2024_v11 }
 0x647   :  { %v2001_v19 = vpop.f32.mrf.mxu1 }
 0x64f   :  { %v2003_v38 = vpop.f32.mrf.mxu1 }
 0x650   :  { %v2025_v20 = vpack.c.bf16 %v2003_v38, %v2001_v19 }
 0x652   :  { %2283 = vmatmul.msk.bf16.gmra.mxu2 %vm1009_vm7, %v2025_v20 }
 0x65b   :  { %v2006_v60 = vpop.f32.mrf.mxu1 }
 0x663   :  { %v2008_v39 = vpop.f32.mrf.mxu1 }
 0x664   :  { %v2026_v61 = vpack.c.bf16 %v2008_v39, %v2006_v60 }
 0x666   :  { %2284 = vmatmul.msk.bf16.gmra.mxu2 %vm1009_vm7, %v2026_v61 }
 0x66c   :  { %v2074_v10 = vpop.f32.mrf.mxu2 }
 0x66d   :  { %v2075_v42 = vadd.f32 %v2338_v54, %v2074_v10 }
 0x66f   :  { %2115 = vst.msk [vmem:[#allocation2] sm:$0xff] %vm2114_vm12, %v2075_v42 }
 0x674   :  { %v2076_v32 = vpop.f32.mrf.mxu2 }
 0x675   :  { %v2077_v13 = vadd.f32 %v2338_v54, %v2076_v32 }
 0x677   :  { %2116 = vst.msk [vmem:[#allocation2 + $0x8] sm:$0xff] %vm2114_vm12, %v2077_v13 }
 0x67b   :  { %v2011_v48 = vpop.f32.mrf.mxu1 }
 0x683   :  { %v2013_v53 = vpop.f32.mrf.mxu1 }
 0x684   :  { %v2027_v5 = vpack.c.bf16 %v2013_v53, %v2011_v48 }
 0x686   :  { %2285 = vmatmul.msk.bf16.gmra.mxu2 %vm1009_vm7, %v2027_v5 }
 0x6a5   :  { %v2079_v7 = vpop.f32.mrf.mxu2 }
 0x6a6   :  { %v2080_v55 = vadd.f32 %v2338_v54, %v2079_v7 }
 0x6a8   :  { %2117 = vst.msk [vmem:[#allocation2 + $0x10] sm:$0xff] %vm2114_vm12, %v2080_v55 }
 0x6ad   :  { %v2081_v1 = vpop.f32.mrf.mxu2 }
 0x6ae   :  { %v2082_v40 = vadd.f32 %v2338_v54, %v2081_v1 }
 0x6b0   :  { %2118 = vst.msk [vmem:[#allocation2 + $0x18] sm:$0xff] %vm2114_vm12, %v2082_v40 }
 0x6b4   :  { %v2016_v49 = vpop.f32.mrf.mxu1 }
 0x6b5   :  { %v2084_v23 = vpop.f32.mrf.mxu2 }
 0x6b6   :  { %v2085_v58 = vadd.f32 %v2338_v54, %v2084_v23 }
 0x6b8   :  { %2119 = vst.msk [vmem:[#allocation2 + $0x20] sm:$0xff] %vm2114_vm12, %v2085_v58 }
 0x6bc   :  { %v2018_v24 = vpop.f32.mrf.mxu1 }
 0x6bd   :  { %v2028_v56 = vpack.c.bf16 %v2018_v24, %v2016_v49  ;;  %v2086_v17 = vpop.f32.mrf.mxu2 }
 0x6be   :  { %v2087_v0 = vadd.f32 %v2338_v54, %v2086_v17 }
 0x6bf   :  { %2286 = vmatmul.msk.bf16.gmra.mxu2 %vm1009_vm7, %v2028_v56 }
 0x6c0   :  { %2120 = vst.msk [vmem:[#allocation2 + $0x28] sm:$0xff] %vm2114_vm12, %v2087_v0 }
 0x6c5   :  { %v2089_v29 = vpop.f32.mrf.mxu2 }
 0x6c6   :  { %v2090_v62 = vadd.f32 %v2338_v54, %v2089_v29 }
 0x6c8   :  { %2121 = vst.msk [vmem:[#allocation2 + $0x30] sm:$0xff] %vm2114_vm12, %v2090_v62 }
 0x6cd   :  { %v2091_v16 = vpop.f32.mrf.mxu2 }
 0x6ce   :  { %v2092_v26 = vadd.f32 %v2338_v54, %v2091_v16 }
 0x6d0   :  { %2122 = vst.msk [vmem:[#allocation2 + $0x38] sm:$0xff] %vm2114_vm12, %v2092_v26 }
 0x6d5   :  { %v2094_v35 = vpop.f32.mrf.mxu2 }
 0x6d6   :  { %v2095_v34 = vadd.f32 %v2338_v54, %v2094_v35 }
 0x6d8   :  { %2123 = vst.msk [vmem:[#allocation2 + $0x40] sm:$0xff] %vm2114_vm12, %v2095_v34 }
 0x6dd   :  { %v2096_v14 = vpop.f32.mrf.mxu2 }
 0x6de   :  { %v2097_v59 = vadd.f32 %v2338_v54, %v2096_v14 }
 0x6e0   :  { %2124 = vst.msk [vmem:[#allocation2 + $0x48] sm:$0xff] %vm2114_vm12, %v2097_v59 }
 0x6e9   :  { %v2099_v50 = vpop.f32.mrf.mxu2 }
 0x6ea   :  { %v2100_v45 = vadd.f32 %v2338_v54, %v2099_v50 }
 0x6ec   :  { %2125 = vst.msk [vmem:[#allocation2 + $0x50] sm:$0xff] %vm2114_vm12, %v2100_v45 }
 0x6f1   :  { %v2101_v27 = vpop.f32.mrf.mxu2 }
 0x6f2   :  { %v2102_v51 = vadd.f32 %v2338_v54, %v2101_v27 }
 0x6f4   :  { %2126 = vst.msk [vmem:[#allocation2 + $0x58] sm:$0xff] %vm2114_vm12, %v2102_v51 }
 0x709   :  { %v2104_v21 = vpop.f32.mrf.mxu2 }
 0x70a   :  { %v2105_v15 = vadd.f32 %v2338_v54, %v2104_v21 }
 0x70c   :  { %2127 = vst.msk [vmem:[#allocation2 + $0x60] sm:$0xff] %vm2114_vm12, %v2105_v15 }
 0x711   :  { %v2106_v33 = vpop.f32.mrf.mxu2 }
 0x712   :  { %v2107_v46 = vadd.f32 %v2338_v54, %v2106_v33 }
 0x714   :  { %2128 = vst.msk [vmem:[#allocation2 + $0x68] sm:$0xff] %vm2114_vm12, %v2107_v46 }
 0x742   :  { %v2109_v9 = vpop.f32.mrf.mxu2 }
 0x743   :  { %v2110_v3 = vadd.f32 %v2338_v54, %v2109_v9 }
 0x745   :  { %2129 = vst.msk [vmem:[#allocation2 + $0x70] sm:$0xff] %vm2114_vm12, %v2110_v3 }
 0x74a   :  { %v2111_v31 = vpop.f32.mrf.mxu2 }
 0x74b   :  { %v2112_v18 = vadd.f32 %v2338_v54, %v2111_v31 }
 0x74d   :  { %2130 = vst.msk [vmem:[#allocation2 + $0x78] sm:$0xff] %vm2114_vm12, %v2112_v18 }
 0x74e   :  { %2143 = dma.vmem_to_hbm [thread:$0]  %s2136_s28, 2048, %s2138_s4, [#allocation3], %s2435_s13, %s2435_s13, %s2436_s8  }
 0x74f   :  { %2427 = dma.done.wait [#allocation3], 2048  }
 0x750   :  { %2428 = vsyncadd [#allocation3], 4294965248 }
 0x751   :  { %2148 = vsyncpa [#allocation3], 1 }

</bundles_post_ra>
